<compile_context>
chip_gen: v7x
topology: tpu7x:2x2x1
jax: 0.10.0
libtpu: 0.0.40
codegen_flags: <defaults>
</compile_context>

<pallas_src>
import functools
import math

import jax
import jax.numpy as jnp
from jax.experimental import pallas as pl
from jax.experimental.pallas import tpu as pltpu


# ----------------------------------------------------------------------------
# Kernel: one fused encoder layer (attention + residual/LN + FFN + residual/LN)
# ----------------------------------------------------------------------------
def encoder_layer_kernel(*refs, num_heads, tq, add_pe):
    x_ref = refs[0]
    i = 1
    pe_ref = None
    if add_pe:
        pe_ref = refs[1]
        i = 2
    (wq_ref, bq_ref, wkv_ref, bkv_ref, wo_ref, bo_ref,
     g1_ref, be1_ref, w1_ref, b1_ref, w2_ref, b2_ref, g2_ref, be2_ref,
     out_ref, k_scr, v_scr, ctx_scr) = refs[i:]

    S, D = x_ref.shape[1], x_ref.shape[2]
    H = num_heads
    dh = D // H
    TQ = tq
    q_idx = pl.program_id(1)
    scale = jnp.float32(1.0 / math.sqrt(dh))

    # --- K/V projection: once per batch row (q_idx == 0), cached in VMEM
    #     scratch across all query tiles. Single merged (S,D)@(D,2D) matmul. ---
    @pl.when(q_idx == 0)
    def _():
        xf = x_ref[0].astype(jnp.float32)                       # (S, D)
        if add_pe:
            xf = xf + pe_ref[...]
        kv = jnp.dot(xf.astype(jnp.bfloat16), wkv_ref[...],
                     preferred_element_type=jnp.float32) + bkv_ref[...]  # (S,2D)
        k_scr[...] = kv[:, :D].astype(jnp.bfloat16)
        v_scr[...] = kv[:, D:].astype(jnp.bfloat16)

    # --- query tile, sliced in-kernel from the resident full-sequence block
    #     (x is DMA'd once per batch row, not once per query tile). ---
    start = pl.multiple_of(q_idx * TQ, TQ)
    xq = x_ref[0, pl.ds(start, TQ), :].astype(jnp.float32)      # (TQ, D)
    if add_pe:                                                  # fused embed+PE
        xq = xq + pe_ref[pl.ds(start, TQ), :]

    # --- Q projection: one lane-dense (TQ, D) @ (D, D) bf16 matmul. ---
    q = jnp.dot(xq.astype(jnp.bfloat16), wq_ref[...],
                preferred_element_type=jnp.float32) + bq_ref[...]
    q = q.astype(jnp.bfloat16)                                  # (TQ, D)

    # --- attention per head (scores / PV inherently contract dh). Softmax is
    #     left un-normalized; normalization is applied to the (TQ,dh) context
    #     after the PV matmul (EUP reciprocal). ---
    for h in range(H):
        sl = slice(h * dh, (h + 1) * dh)
        s = jax.lax.dot_general(q[:, sl], k_scr[:, sl],
                                (((1,), (1,)), ((), ())),
                                preferred_element_type=jnp.float32) * scale
        m = jnp.max(s, axis=-1, keepdims=True)
        p = jnp.exp(s - m)
        l = jnp.sum(p, axis=-1, keepdims=True)
        ctx = jnp.dot(p.astype(jnp.bfloat16), v_scr[:, sl],
                      preferred_element_type=jnp.float32)       # (TQ, dh)
        ctx = ctx * pl.reciprocal(l, approx=True)
        ctx_scr[:, sl] = ctx.astype(jnp.bfloat16)

    # --- output projection: single (TQ, D) @ (D, D) matmul; cross-head
    #     reduction happens inside the MXU contraction (K = D). ---
    attn = jnp.dot(ctx_scr[...], wo_ref[...],
                   preferred_element_type=jnp.float32) + bo_ref[...]

    # --- residual + LayerNorm 1 (f32) ---
    h1 = xq + attn
    mu1 = jnp.mean(h1, axis=-1, keepdims=True)
    var1 = jnp.mean(jnp.square(h1 - mu1), axis=-1, keepdims=True)
    h1 = (h1 - mu1) * jax.lax.rsqrt(var1 + 1e-5) * g1_ref[...] + be1_ref[...]

    # --- feed-forward (Linear -> ReLU -> Linear), bf16 MXU / f32 accumulate ---
    f = jnp.dot(h1.astype(jnp.bfloat16), w1_ref[...],
                preferred_element_type=jnp.float32) + b1_ref[...]
    f = jnp.maximum(f, 0.0)
    f = jnp.dot(f.astype(jnp.bfloat16), w2_ref[...],
                preferred_element_type=jnp.float32) + b2_ref[...]

    # --- residual + LayerNorm 2 (f32), single lane-dense store ---
    h2 = h1 + f
    mu2 = jnp.mean(h2, axis=-1, keepdims=True)
    var2 = jnp.mean(jnp.square(h2 - mu2), axis=-1, keepdims=True)
    out = (h2 - mu2) * jax.lax.rsqrt(var2 + 1e-5) * g2_ref[...] + be2_ref[...]
    out_ref[0] = out.astype(out_ref.dtype)


# ----------------------------------------------------------------------------
# Wrappers
# ----------------------------------------------------------------------------
def _pick_query_tile(seq_len):
    """Largest divisor of seq_len that is a multiple of 8 and <= 256."""
    best = None
    for t in range(8, min(seq_len, 256) + 1, 8):
        if seq_len % t == 0:
            best = t
    return best if best is not None else seq_len


def _vmem_limit_bytes():
    """Generation-aware VMEM limit with ~15% headroom for Mosaic scratch."""
    try:
        cap = pltpu.get_tpu_info().vmem_capacity_bytes
    except Exception:
        cap = 64 * 1024 * 1024
    return int(cap * 0.85)


def encoder_layer(x, p, num_heads, pe=None, out_dtype=jnp.float32):
    """One encoder layer as a single pallas_call, grid = (batch, query_tiles)."""
    B, S, D = x.shape
    assert D % num_heads == 0
    TQ = _pick_query_tile(S)
    NQ = S // TQ
    add_pe = pe is not None

    def wspec(arr):
        return pl.BlockSpec(arr.shape, lambda b, q: (0,) * arr.ndim)

    in_specs = [pl.BlockSpec((1, S, D), lambda b, q: (b, 0, 0))]   # x, full seq
    args = [x]
    if add_pe:
        in_specs.append(pl.BlockSpec((S, D), lambda b, q: (0, 0)))
        args.append(pe)

    weight_keys = ("wq", "bq", "wkv", "bkv", "wo", "bo",
                   "g1", "be1", "w1", "b1", "w2", "b2", "g2", "be2")
    in_specs += [wspec(p[k]) for k in weight_keys]
    args += [p[k] for k in weight_keys]

    scratch_shapes = [
        pltpu.VMEM((S, D), jnp.bfloat16),    # cached K (per batch row)
        pltpu.VMEM((S, D), jnp.bfloat16),    # cached V (per batch row)
        pltpu.VMEM((TQ, D), jnp.bfloat16),   # lane-dense per-head context slab
    ]

    return pl.pallas_call(
        functools.partial(encoder_layer_kernel,
                          num_heads=num_heads, tq=TQ, add_pe=add_pe),
        out_shape=jax.ShapeDtypeStruct((B, S, D), out_dtype),
        grid=(B, NQ),
        in_specs=in_specs,
        out_specs=pl.BlockSpec((1, TQ, D), lambda b, q: (b, q, 0)),
        scratch_shapes=scratch_shapes,
        compiler_params=pltpu.CompilerParams(
            # q axis is "arbitrary": K/V scratch is carried across query tiles.
            dimension_semantics=("parallel", "arbitrary"),
            vmem_limit_bytes=_vmem_limit_bytes()),
    )(*args)


def sinusoidal_pe(seq_len, d_model):
    pos = jnp.arange(seq_len, dtype=jnp.float32)[:, None]
    i = jnp.arange(0, d_model, 2, dtype=jnp.float32)
    div = jnp.exp(-math.log(10000.0) * i / d_model)
    pe = jnp.zeros((seq_len, d_model), jnp.float32)
    pe = pe.at[:, 0::2].set(jnp.sin(pos * div))
    pe = pe.at[:, 1::2].set(jnp.cos(pos * div))
    return pe


def init_params(key, vocab_size, d_model, d_ff, num_layers):
    keys = jax.random.split(key, 1 + 7 * num_layers)
    emb_table = 0.02 * jax.random.normal(keys[0], (vocab_size, d_model), jnp.float32)
    layers = []
    ki = 1
    for _ in range(num_layers):
        p = {
            "wq": 0.02 * jax.random.normal(keys[ki + 0], (d_model, d_model), jnp.float32),
            "wk": 0.02 * jax.random.normal(keys[ki + 1], (d_model, d_model), jnp.float32),
            "wv": 0.02 * jax.random.normal(keys[ki + 2], (d_model, d_model), jnp.float32),
            "wo": 0.02 * jax.random.normal(keys[ki + 3], (d_model, d_model), jnp.float32),
            "bq": jnp.zeros((1, d_model), jnp.float32),
            "bk": jnp.zeros((1, d_model), jnp.float32),
            "bv": jnp.zeros((1, d_model), jnp.float32),
            "bo": jnp.zeros((1, d_model), jnp.float32),
            "w1": 0.02 * jax.random.normal(keys[ki + 4], (d_model, d_ff), jnp.float32),
            "b1": jnp.zeros((1, d_ff), jnp.float32),
            "w2": 0.02 * jax.random.normal(keys[ki + 5], (d_ff, d_model), jnp.float32),
            "b2": jnp.zeros((1, d_model), jnp.float32),
            "g1": jnp.ones((1, d_model), jnp.float32),
            "be1": jnp.zeros((1, d_model), jnp.float32),
            "g2": jnp.ones((1, d_model), jnp.float32),
            "be2": jnp.zeros((1, d_model), jnp.float32),
        }
        layers.append(p)
        ki += 7
    return emb_table, layers


def prepare_layer_params(raw):
    """Stack Wk|Wv along lanes (merged K/V projection) and cast matmul weights
    to bf16.  Biases / LayerNorm params stay f32."""
    wkv = jnp.concatenate([raw["wk"], raw["wv"]], axis=1)       # (D, 2D)
    bkv = jnp.concatenate([raw["bk"], raw["bv"]], axis=1)       # (1, 2D)
    return {
        "wq": raw["wq"].astype(jnp.bfloat16), "bq": raw["bq"],
        "wkv": wkv.astype(jnp.bfloat16), "bkv": bkv,
        "wo": raw["wo"].astype(jnp.bfloat16), "bo": raw["bo"],
        "g1": raw["g1"], "be1": raw["be1"],
        "w1": raw["w1"].astype(jnp.bfloat16), "b1": raw["b1"],
        "w2": raw["w2"].astype(jnp.bfloat16), "b2": raw["b2"],
        "g2": raw["g2"], "be2": raw["be2"],
    }


def encoder_forward(tokens, emb_table_scaled, layer_params, num_heads):
    # tokens: [B, S] int32.  emb_table_scaled already includes sqrt(d_model).
    B, S = tokens.shape
    d_model = emb_table_scaled.shape[1]
    emb = jnp.take(emb_table_scaled, tokens, axis=0)     # glue: embedding gather
    pe = sinusoidal_pe(S, d_model)
    if not layer_params:
        return emb + pe
    x = emb
    n = len(layer_params)
    for li, p in enumerate(layer_params):
        # PE fused into layer 0's kernel; inter-layer activations in bf16,
        # final layer stores f32.
        out_dtype = jnp.float32 if li == n - 1 else jnp.bfloat16
        x = encoder_layer(x, p, num_heads,
                          pe=pe if li == 0 else None, out_dtype=out_dtype)
    return x
# TODO(synk): dropout is treated as identity (inference mode); training-mode
# stochastic dropout would need pltpu.prng_* inside the kernels.


if __name__ == "__main__":
    B, S = 2, 8
    vocab_size, d_model, num_heads, d_ff, num_layers = 50, 128, 4, 256, 2

    key = jax.random.PRNGKey(0)
    k_tok, k_par = jax.random.split(key)
    tokens = jax.random.randint(k_tok, (B, S), 0, vocab_size, dtype=jnp.int32)
    emb_table, raw_layers = init_params(k_par, vocab_size, d_model, d_ff, num_layers)

    # Fold the sqrt(d_model) embedding scale into the table (fused embed+PE).
    emb_table_scaled = emb_table * jnp.float32(math.sqrt(d_model))
    layer_params = [prepare_layer_params(p) for p in raw_layers]

    fwd = jax.jit(functools.partial(encoder_forward, num_heads=num_heads))
    out = jax.block_until_ready(fwd(tokens, emb_table_scaled, layer_params))

    assert out.shape == (B, S, d_model) and out.dtype == jnp.float32
    assert bool(jnp.all(jnp.isfinite(out)))
    print("KERNEL_OK")
</pallas_src>

<mosaic_0001>
module attributes {stable_mosaic.version = 11 : i64} {
  func.func @encoder_layer_kernel(%arg0: i32, %arg1: i32, %arg2: memref<1x8x128xf32, #tpu.memory_space<vmem>>, %arg3: memref<8x128xf32, #tpu.memory_space<vmem>>, %arg4: memref<128x128xbf16, #tpu.memory_space<vmem>>, %arg5: memref<1x128xf32, #tpu.memory_space<vmem>>, %arg6: memref<128x256xbf16, #tpu.memory_space<vmem>>, %arg7: memref<1x256xf32, #tpu.memory_space<vmem>>, %arg8: memref<128x128xbf16, #tpu.memory_space<vmem>>, %arg9: memref<1x128xf32, #tpu.memory_space<vmem>>, %arg10: memref<1x128xf32, #tpu.memory_space<vmem>>, %arg11: memref<1x128xf32, #tpu.memory_space<vmem>>, %arg12: memref<128x256xbf16, #tpu.memory_space<vmem>>, %arg13: memref<1x256xf32, #tpu.memory_space<vmem>>, %arg14: memref<256x128xbf16, #tpu.memory_space<vmem>>, %arg15: memref<1x128xf32, #tpu.memory_space<vmem>>, %arg16: memref<1x128xf32, #tpu.memory_space<vmem>>, %arg17: memref<1x128xf32, #tpu.memory_space<vmem>>, %arg18: memref<1x8x128xbf16, #tpu.memory_space<vmem>>, %arg19: memref<8x128xbf16, #tpu.memory_space<vmem>>, %arg20: memref<8x128xbf16, #tpu.memory_space<vmem>>, %arg21: memref<8x128xbf16, #tpu.memory_space<vmem>>) attributes {dimension_semantics = [#tpu.dimension_semantics<parallel>, #tpu.dimension_semantics<arbitrary>], iteration_bounds = array<i64: 2, 1>, scalar_prefetch = 0 : i64, scratch_operands = 3 : i64, tpu.core_type = #tpu.core_type<tc>, window_params = [{transform_indices = @transform_0, window_bounds = array<i64: 1, 8, 128>}, {pipeline_mode = #tpu.pipeline_mode<synchronous>, transform_indices = @transform_1, window_bounds = array<i64: 8, 128>}, {pipeline_mode = #tpu.pipeline_mode<synchronous>, transform_indices = @transform_2, window_bounds = array<i64: 128, 128>}, {pipeline_mode = #tpu.pipeline_mode<synchronous>, transform_indices = @transform_3, window_bounds = array<i64: 1, 128>}, {pipeline_mode = #tpu.pipeline_mode<synchronous>, transform_indices = @transform_4, window_bounds = array<i64: 128, 256>}, {pipeline_mode = #tpu.pipeline_mode<synchronous>, transform_indices = @transform_5, window_bounds = array<i64: 1, 256>}, {pipeline_mode = #tpu.pipeline_mode<synchronous>, transform_indices = @transform_6, window_bounds = array<i64: 128, 128>}, {pipeline_mode = #tpu.pipeline_mode<synchronous>, transform_indices = @transform_7, window_bounds = array<i64: 1, 128>}, {pipeline_mode = #tpu.pipeline_mode<synchronous>, transform_indices = @transform_8, window_bounds = array<i64: 1, 128>}, {pipeline_mode = #tpu.pipeline_mode<synchronous>, transform_indices = @transform_9, window_bounds = array<i64: 1, 128>}, {pipeline_mode = #tpu.pipeline_mode<synchronous>, transform_indices = @transform_10, window_bounds = array<i64: 128, 256>}, {pipeline_mode = #tpu.pipeline_mode<synchronous>, transform_indices = @transform_11, window_bounds = array<i64: 1, 256>}, {pipeline_mode = #tpu.pipeline_mode<synchronous>, transform_indices = @transform_12, window_bounds = array<i64: 256, 128>}, {pipeline_mode = #tpu.pipeline_mode<synchronous>, transform_indices = @transform_13, window_bounds = array<i64: 1, 128>}, {pipeline_mode = #tpu.pipeline_mode<synchronous>, transform_indices = @transform_14, window_bounds = array<i64: 1, 128>}, {pipeline_mode = #tpu.pipeline_mode<synchronous>, transform_indices = @transform_15, window_bounds = array<i64: 1, 128>}, {transform_indices = @transform_16, window_bounds = array<i64: 1, 8, 128>}]} {
    %c0_i32 = arith.constant 0 : i32
    %0 = arith.cmpi eq, %arg1, %c0_i32 : i32
    %1 = arith.extui %0 : i1 to i32
    %c0_i32_0 = arith.constant 0 : i32
    %2 = arith.cmpi ne, %1, %c0_i32_0 : i32
    scf.if %2 {
      %c0_87 = arith.constant 0 : index
      %c0_88 = arith.constant 0 : index
      %c0_89 = arith.constant 0 : index
      %172 = vector.load %arg2[%c0_87, %c0_88, %c0_89] : memref<1x8x128xf32, #tpu.memory_space<vmem>>, vector<1x8x128xf32>
      %173 = vector.shape_cast %172 : vector<1x8x128xf32> to vector<8x128xf32>
      %c0_90 = arith.constant 0 : index
      %c0_91 = arith.constant 0 : index
      %174 = vector.load %arg3[%c0_90, %c0_91] : memref<8x128xf32, #tpu.memory_space<vmem>>, vector<8x128xf32>
      %175 = arith.addf %173, %174 : vector<8x128xf32>
      %176 = arith.truncf %175 : vector<8x128xf32> to vector<8x128xbf16>
      %c0_92 = arith.constant 0 : index
      %c0_93 = arith.constant 0 : index
      %177 = vector.load %arg6[%c0_92, %c0_93] : memref<128x256xbf16, #tpu.memory_space<vmem>>, vector<128x256xbf16>
      %cst_94 = arith.constant dense<0.000000e+00> : vector<8x256xf32>
      %178 = tpu.matmul %176, %177, %cst_94 {dimension_numbers = #tpu.dot_dimension_numbers<[1], [0], [0], [1], [0, 0, 1, 1], [], []>} : vector<8x128xbf16>, vector<128x256xbf16>, vector<8x256xf32> -> vector<8x256xf32>
      %c0_95 = arith.constant 0 : index
      %c0_96 = arith.constant 0 : index
      %179 = vector.load %arg7[%c0_95, %c0_96] : memref<1x256xf32, #tpu.memory_space<vmem>>, vector<1x256xf32>
      %180 = vector.broadcast %179 : vector<1x256xf32> to vector<8x256xf32>
      %181 = arith.addf %178, %180 : vector<8x256xf32>
      %182 = vector.extract_strided_slice %181 {offsets = [0, 0], sizes = [8, 128], strides = [1, 1]} : vector<8x256xf32> to vector<8x128xf32>
      %183 = arith.truncf %182 : vector<8x128xf32> to vector<8x128xbf16>
      %c0_97 = arith.constant 0 : index
      %c0_98 = arith.constant 0 : index
      %184 = vector.load %arg19[%c0_97, %c0_98] : memref<8x128xbf16, #tpu.memory_space<vmem>>, vector<8x128xbf16>
      tpu.vector_store %arg19[%c0_97, %c0_98], %183 {strides = array<i32>} : memref<8x128xbf16, #tpu.memory_space<vmem>>, vector<8x128xbf16>,
      %185 = vector.extract_strided_slice %181 {offsets = [0, 128], sizes = [8, 128], strides = [1, 1]} : vector<8x256xf32> to vector<8x128xf32>
      %186 = arith.truncf %185 : vector<8x128xf32> to vector<8x128xbf16>
      %c0_99 = arith.constant 0 : index
      %c0_100 = arith.constant 0 : index
      %187 = vector.load %arg20[%c0_99, %c0_100] : memref<8x128xbf16, #tpu.memory_space<vmem>>, vector<8x128xbf16>
      tpu.vector_store %arg20[%c0_99, %c0_100], %186 {strides = array<i32>} : memref<8x128xbf16, #tpu.memory_space<vmem>>, vector<8x128xbf16>,
    } else {
    }
    %c8_i32 = arith.constant 8 : i32
    %3 = arith.muli %arg1, %c8_i32 : i32
    %4 = tpu.assume_multiple %3, 8 : i32
    %c0 = arith.constant 0 : index
    %5 = arith.index_cast %4 : i32 to index
    %c0_1 = arith.constant 0 : index
    %6 = vector.load %arg2[%c0, %5, %c0_1] : memref<1x8x128xf32, #tpu.memory_space<vmem>>, vector<1x8x128xf32>
    %7 = vector.shape_cast %6 : vector<1x8x128xf32> to vector<8x128xf32>
    %8 = arith.index_cast %4 : i32 to index
    %c0_2 = arith.constant 0 : index
    %9 = vector.load %arg3[%8, %c0_2] : memref<8x128xf32, #tpu.memory_space<vmem>>, vector<8x128xf32>
    %10 = arith.addf %7, %9 : vector<8x128xf32>
    %11 = arith.truncf %10 : vector<8x128xf32> to vector<8x128xbf16>
    %c0_3 = arith.constant 0 : index
    %c0_4 = arith.constant 0 : index
    %12 = vector.load %arg4[%c0_3, %c0_4] : memref<128x128xbf16, #tpu.memory_space<vmem>>, vector<128x128xbf16>
    %cst = arith.constant dense<0.000000e+00> : vector<8x128xf32>
    %13 = tpu.matmul %11, %12, %cst {dimension_numbers = #tpu.dot_dimension_numbers<[1], [0], [0], [1], [0, 0, 1, 1], [], []>} : vector<8x128xbf16>, vector<128x128xbf16>, vector<8x128xf32> -> vector<8x128xf32>
    %c0_5 = arith.constant 0 : index
    %c0_6 = arith.constant 0 : index
    %14 = vector.load %arg5[%c0_5, %c0_6] : memref<1x128xf32, #tpu.memory_space<vmem>>, vector<1x128xf32>
    %15 = vector.broadcast %14 : vector<1x128xf32> to vector<8x128xf32>
    %16 = arith.addf %13, %15 : vector<8x128xf32>
    %17 = arith.truncf %16 : vector<8x128xf32> to vector<8x128xbf16>
    %18 = vector.extract_strided_slice %17 {offsets = [0, 0], sizes = [8, 32], strides = [1, 1]} : vector<8x128xbf16> to vector<8x32xbf16>
    %c0_7 = arith.constant 0 : index
    %c0_8 = arith.constant 0 : index
    %19 = vector.load %arg19[%c0_7, %c0_8] : memref<8x128xbf16, #tpu.memory_space<vmem>>, vector<8x32xbf16>
    %cst_9 = arith.constant dense<0.000000e+00> : vector<8x8xf32>
    %20 = tpu.matmul %18, %19, %cst_9 {dimension_numbers = #tpu.dot_dimension_numbers<[1], [1], [0], [0], [0, 0, 1, 0], [], []>} : vector<8x32xbf16>, vector<8x32xbf16>, vector<8x8xf32> -> vector<8x8xf32>
    %cst_10 = arith.constant 0.176776692 : f32
    %21 = vector.broadcast %cst_10 : f32 to vector<8x8xf32>
    %22 = arith.mulf %20, %21 : vector<8x8xf32>
    %cst_11 = arith.constant dense<0xFF800000> : vector<8xf32>
    %23 = vector.multi_reduction <maximumf>, %22, %cst_11 [1] : vector<8x8xf32> to vector<8xf32>
    %24 = vector.shape_cast %23 : vector<8xf32> to vector<8x1xf32>
    %25 = vector.broadcast %24 : vector<8x1xf32> to vector<8x8xf32>
    %26 = arith.subf %22, %25 : vector<8x8xf32>
    %27 = math.exp %26 : vector<8x8xf32>
    %cst_12 = arith.constant dense<0.000000e+00> : vector<8xf32>
    %28 = vector.multi_reduction <add>, %27, %cst_12 [1] : vector<8x8xf32> to vector<8xf32>
    %29 = vector.shape_cast %28 : vector<8xf32> to vector<8x1xf32>
    %30 = arith.truncf %27 : vector<8x8xf32> to vector<8x8xbf16>
    %c0_13 = arith.constant 0 : index
    %c0_14 = arith.constant 0 : index
    %31 = vector.load %arg20[%c0_13, %c0_14] : memref<8x128xbf16, #tpu.memory_space<vmem>>, vector<8x32xbf16>
    %cst_15 = arith.constant dense<0.000000e+00> : vector<8x32xf32>
    %32 = tpu.matmul %30, %31, %cst_15 {dimension_numbers = #tpu.dot_dimension_numbers<[1], [0], [0], [1], [0, 0, 1, 1], [], []>} : vector<8x8xbf16>, vector<8x32xbf16>, vector<8x32xf32> -> vector<8x32xf32>
    %33 = tpu.reciprocal %29 {approx = true} : vector<8x1xf32> -> vector<8x1xf32>
    %34 = vector.broadcast %33 : vector<8x1xf32> to vector<8x32xf32>
    %35 = arith.mulf %32, %34 : vector<8x32xf32>
    %36 = arith.truncf %35 : vector<8x32xf32> to vector<8x32xbf16>
    %c0_16 = arith.constant 0 : index
    %c0_17 = arith.constant 0 : index
    %37 = vector.load %arg21[%c0_16, %c0_17] : memref<8x128xbf16, #tpu.memory_space<vmem>>, vector<8x32xbf16>
    tpu.vector_store %arg21[%c0_16, %c0_17], %36 {strides = array<i32>} : memref<8x128xbf16, #tpu.memory_space<vmem>>, vector<8x32xbf16>,
    %38 = vector.extract_strided_slice %17 {offsets = [0, 32], sizes = [8, 32], strides = [1, 1]} : vector<8x128xbf16> to vector<8x32xbf16>
    %c0_18 = arith.constant 0 : index
    %c32 = arith.constant 32 : index
    %39 = vector.load %arg19[%c0_18, %c32] : memref<8x128xbf16, #tpu.memory_space<vmem>>, vector<8x32xbf16>
    %cst_19 = arith.constant dense<0.000000e+00> : vector<8x8xf32>
    %40 = tpu.matmul %38, %39, %cst_19 {dimension_numbers = #tpu.dot_dimension_numbers<[1], [1], [0], [0], [0, 0, 1, 0], [], []>} : vector<8x32xbf16>, vector<8x32xbf16>, vector<8x8xf32> -> vector<8x8xf32>
    %cst_20 = arith.constant 0.176776692 : f32
    %41 = vector.broadcast %cst_20 : f32 to vector<8x8xf32>
    %42 = arith.mulf %40, %41 : vector<8x8xf32>
    %cst_21 = arith.constant dense<0xFF800000> : vector<8xf32>
    %43 = vector.multi_reduction <maximumf>, %42, %cst_21 [1] : vector<8x8xf32> to vector<8xf32>
    %44 = vector.shape_cast %43 : vector<8xf32> to vector<8x1xf32>
    %45 = vector.broadcast %44 : vector<8x1xf32> to vector<8x8xf32>
    %46 = arith.subf %42, %45 : vector<8x8xf32>
    %47 = math.exp %46 : vector<8x8xf32>
    %cst_22 = arith.constant dense<0.000000e+00> : vector<8xf32>
    %48 = vector.multi_reduction <add>, %47, %cst_22 [1] : vector<8x8xf32> to vector<8xf32>
    %49 = vector.shape_cast %48 : vector<8xf32> to vector<8x1xf32>
    %50 = arith.truncf %47 : vector<8x8xf32> to vector<8x8xbf16>
    %c0_23 = arith.constant 0 : index
    %c32_24 = arith.constant 32 : index
    %51 = vector.load %arg20[%c0_23, %c32_24] : memref<8x128xbf16, #tpu.memory_space<vmem>>, vector<8x32xbf16>
    %cst_25 = arith.constant dense<0.000000e+00> : vector<8x32xf32>
    %52 = tpu.matmul %50, %51, %cst_25 {dimension_numbers = #tpu.dot_dimension_numbers<[1], [0], [0], [1], [0, 0, 1, 1], [], []>} : vector<8x8xbf16>, vector<8x32xbf16>, vector<8x32xf32> -> vector<8x32xf32>
    %53 = tpu.reciprocal %49 {approx = true} : vector<8x1xf32> -> vector<8x1xf32>
    %54 = vector.broadcast %53 : vector<8x1xf32> to vector<8x32xf32>
    %55 = arith.mulf %52, %54 : vector<8x32xf32>
    %56 = arith.truncf %55 : vector<8x32xf32> to vector<8x32xbf16>
    %c0_26 = arith.constant 0 : index
    %c32_27 = arith.constant 32 : index
    %57 = vector.load %arg21[%c0_26, %c32_27] : memref<8x128xbf16, #tpu.memory_space<vmem>>, vector<8x32xbf16>
    tpu.vector_store %arg21[%c0_26, %c32_27], %56 {strides = array<i32>} : memref<8x128xbf16, #tpu.memory_space<vmem>>, vector<8x32xbf16>,
    %58 = vector.extract_strided_slice %17 {offsets = [0, 64], sizes = [8, 32], strides = [1, 1]} : vector<8x128xbf16> to vector<8x32xbf16>
    %c0_28 = arith.constant 0 : index
    %c64 = arith.constant 64 : index
    %59 = vector.load %arg19[%c0_28, %c64] : memref<8x128xbf16, #tpu.memory_space<vmem>>, vector<8x32xbf16>
    %cst_29 = arith.constant dense<0.000000e+00> : vector<8x8xf32>
    %60 = tpu.matmul %58, %59, %cst_29 {dimension_numbers = #tpu.dot_dimension_numbers<[1], [1], [0], [0], [0, 0, 1, 0], [], []>} : vector<8x32xbf16>, vector<8x32xbf16>, vector<8x8xf32> -> vector<8x8xf32>
    %cst_30 = arith.constant 0.176776692 : f32
    %61 = vector.broadcast %cst_30 : f32 to vector<8x8xf32>
    %62 = arith.mulf %60, %61 : vector<8x8xf32>
    %cst_31 = arith.constant dense<0xFF800000> : vector<8xf32>
    %63 = vector.multi_reduction <maximumf>, %62, %cst_31 [1] : vector<8x8xf32> to vector<8xf32>
    %64 = vector.shape_cast %63 : vector<8xf32> to vector<8x1xf32>
    %65 = vector.broadcast %64 : vector<8x1xf32> to vector<8x8xf32>
    %66 = arith.subf %62, %65 : vector<8x8xf32>
    %67 = math.exp %66 : vector<8x8xf32>
    %cst_32 = arith.constant dense<0.000000e+00> : vector<8xf32>
    %68 = vector.multi_reduction <add>, %67, %cst_32 [1] : vector<8x8xf32> to vector<8xf32>
    %69 = vector.shape_cast %68 : vector<8xf32> to vector<8x1xf32>
    %70 = arith.truncf %67 : vector<8x8xf32> to vector<8x8xbf16>
    %c0_33 = arith.constant 0 : index
    %c64_34 = arith.constant 64 : index
    %71 = vector.load %arg20[%c0_33, %c64_34] : memref<8x128xbf16, #tpu.memory_space<vmem>>, vector<8x32xbf16>
    %cst_35 = arith.constant dense<0.000000e+00> : vector<8x32xf32>
    %72 = tpu.matmul %70, %71, %cst_35 {dimension_numbers = #tpu.dot_dimension_numbers<[1], [0], [0], [1], [0, 0, 1, 1], [], []>} : vector<8x8xbf16>, vector<8x32xbf16>, vector<8x32xf32> -> vector<8x32xf32>
    %73 = tpu.reciprocal %69 {approx = true} : vector<8x1xf32> -> vector<8x1xf32>
    %74 = vector.broadcast %73 : vector<8x1xf32> to vector<8x32xf32>
    %75 = arith.mulf %72, %74 : vector<8x32xf32>
    %76 = arith.truncf %75 : vector<8x32xf32> to vector<8x32xbf16>
    %c0_36 = arith.constant 0 : index
    %c64_37 = arith.constant 64 : index
    %77 = vector.load %arg21[%c0_36, %c64_37] : memref<8x128xbf16, #tpu.memory_space<vmem>>, vector<8x32xbf16>
    tpu.vector_store %arg21[%c0_36, %c64_37], %76 {strides = array<i32>} : memref<8x128xbf16, #tpu.memory_space<vmem>>, vector<8x32xbf16>,
    %78 = vector.extract_strided_slice %17 {offsets = [0, 96], sizes = [8, 32], strides = [1, 1]} : vector<8x128xbf16> to vector<8x32xbf16>
    %c0_38 = arith.constant 0 : index
    %c96 = arith.constant 96 : index
    %79 = vector.load %arg19[%c0_38, %c96] : memref<8x128xbf16, #tpu.memory_space<vmem>>, vector<8x32xbf16>
    %cst_39 = arith.constant dense<0.000000e+00> : vector<8x8xf32>
    %80 = tpu.matmul %78, %79, %cst_39 {dimension_numbers = #tpu.dot_dimension_numbers<[1], [1], [0], [0], [0, 0, 1, 0], [], []>} : vector<8x32xbf16>, vector<8x32xbf16>, vector<8x8xf32> -> vector<8x8xf32>
    %cst_40 = arith.constant 0.176776692 : f32
    %81 = vector.broadcast %cst_40 : f32 to vector<8x8xf32>
    %82 = arith.mulf %80, %81 : vector<8x8xf32>
    %cst_41 = arith.constant dense<0xFF800000> : vector<8xf32>
    %83 = vector.multi_reduction <maximumf>, %82, %cst_41 [1] : vector<8x8xf32> to vector<8xf32>
    %84 = vector.shape_cast %83 : vector<8xf32> to vector<8x1xf32>
    %85 = vector.broadcast %84 : vector<8x1xf32> to vector<8x8xf32>
    %86 = arith.subf %82, %85 : vector<8x8xf32>
    %87 = math.exp %86 : vector<8x8xf32>
    %cst_42 = arith.constant dense<0.000000e+00> : vector<8xf32>
    %88 = vector.multi_reduction <add>, %87, %cst_42 [1] : vector<8x8xf32> to vector<8xf32>
    %89 = vector.shape_cast %88 : vector<8xf32> to vector<8x1xf32>
    %90 = arith.truncf %87 : vector<8x8xf32> to vector<8x8xbf16>
    %c0_43 = arith.constant 0 : index
    %c96_44 = arith.constant 96 : index
    %91 = vector.load %arg20[%c0_43, %c96_44] : memref<8x128xbf16, #tpu.memory_space<vmem>>, vector<8x32xbf16>
    %cst_45 = arith.constant dense<0.000000e+00> : vector<8x32xf32>
    %92 = tpu.matmul %90, %91, %cst_45 {dimension_numbers = #tpu.dot_dimension_numbers<[1], [0], [0], [1], [0, 0, 1, 1], [], []>} : vector<8x8xbf16>, vector<8x32xbf16>, vector<8x32xf32> -> vector<8x32xf32>
    %93 = tpu.reciprocal %89 {approx = true} : vector<8x1xf32> -> vector<8x1xf32>
    %94 = vector.broadcast %93 : vector<8x1xf32> to vector<8x32xf32>
    %95 = arith.mulf %92, %94 : vector<8x32xf32>
    %96 = arith.truncf %95 : vector<8x32xf32> to vector<8x32xbf16>
    %c0_46 = arith.constant 0 : index
    %c96_47 = arith.constant 96 : index
    %97 = vector.load %arg21[%c0_46, %c96_47] : memref<8x128xbf16, #tpu.memory_space<vmem>>, vector<8x32xbf16>
    tpu.vector_store %arg21[%c0_46, %c96_47], %96 {strides = array<i32>} : memref<8x128xbf16, #tpu.memory_space<vmem>>, vector<8x32xbf16>,
    %c0_48 = arith.constant 0 : index
    %c0_49 = arith.constant 0 : index
    %98 = vector.load %arg21[%c0_48, %c0_49] : memref<8x128xbf16, #tpu.memory_space<vmem>>, vector<8x128xbf16>
    %c0_50 = arith.constant 0 : index
    %c0_51 = arith.constant 0 : index
    %99 = vector.load %arg8[%c0_50, %c0_51] : memref<128x128xbf16, #tpu.memory_space<vmem>>, vector<128x128xbf16>
    %cst_52 = arith.constant dense<0.000000e+00> : vector<8x128xf32>
    %100 = tpu.matmul %98, %99, %cst_52 {dimension_numbers = #tpu.dot_dimension_numbers<[1], [0], [0], [1], [0, 0, 1, 1], [], []>} : vector<8x128xbf16>, vector<128x128xbf16>, vector<8x128xf32> -> vector<8x128xf32>
    %c0_53 = arith.constant 0 : index
    %c0_54 = arith.constant 0 : index
    %101 = vector.load %arg9[%c0_53, %c0_54] : memref<1x128xf32, #tpu.memory_space<vmem>>, vector<1x128xf32>
    %102 = vector.broadcast %101 : vector<1x128xf32> to vector<8x128xf32>
    %103 = arith.addf %100, %102 : vector<8x128xf32>
    %104 = arith.addf %10, %103 : vector<8x128xf32>
    %cst_55 = arith.constant dense<0.000000e+00> : vector<8xf32>
    %105 = vector.multi_reduction <add>, %104, %cst_55 [1] : vector<8x128xf32> to vector<8xf32>
    %106 = vector.shape_cast %105 : vector<8xf32> to vector<8x1xf32>
    %cst_56 = arith.constant 1.280000e+02 : f32
    %107 = vector.broadcast %cst_56 : f32 to vector<8x1xf32>
    %108 = arith.divf %106, %107 : vector<8x1xf32>
    %109 = vector.broadcast %108 : vector<8x1xf32> to vector<8x128xf32>
    %110 = arith.subf %104, %109 : vector<8x128xf32>
    %111 = arith.mulf %110, %110 : vector<8x128xf32>
    %cst_57 = arith.constant dense<0.000000e+00> : vector<8xf32>
    %112 = vector.multi_reduction <add>, %111, %cst_57 [1] : vector<8x128xf32> to vector<8xf32>
    %113 = vector.shape_cast %112 : vector<8xf32> to vector<8x1xf32>
    %cst_58 = arith.constant 1.280000e+02 : f32
    %114 = vector.broadcast %cst_58 : f32 to vector<8x1xf32>
    %115 = arith.divf %113, %114 : vector<8x1xf32>
    %116 = vector.broadcast %108 : vector<8x1xf32> to vector<8x128xf32>
    %117 = arith.subf %104, %116 : vector<8x128xf32>
    %cst_59 = arith.constant 9.99999974E-6 : f32
    %118 = vector.broadcast %cst_59 : f32 to vector<8x1xf32>
    %119 = arith.addf %115, %118 : vector<8x1xf32>
    %120 = math.rsqrt %119 : vector<8x1xf32>
    %121 = vector.broadcast %120 : vector<8x1xf32> to vector<8x128xf32>
    %122 = arith.mulf %117, %121 : vector<8x128xf32>
    %c0_60 = arith.constant 0 : index
    %c0_61 = arith.constant 0 : index
    %123 = vector.load %arg10[%c0_60, %c0_61] : memref<1x128xf32, #tpu.memory_space<vmem>>, vector<1x128xf32>
    %124 = vector.broadcast %123 : vector<1x128xf32> to vector<8x128xf32>
    %125 = arith.mulf %122, %124 : vector<8x128xf32>
    %c0_62 = arith.constant 0 : index
    %c0_63 = arith.constant 0 : index
    %126 = vector.load %arg11[%c0_62, %c0_63] : memref<1x128xf32, #tpu.memory_space<vmem>>, vector<1x128xf32>
    %127 = vector.broadcast %126 : vector<1x128xf32> to vector<8x128xf32>
    %128 = arith.addf %125, %127 : vector<8x128xf32>
    %129 = arith.truncf %128 : vector<8x128xf32> to vector<8x128xbf16>
    %c0_64 = arith.constant 0 : index
    %c0_65 = arith.constant 0 : index
    %130 = vector.load %arg12[%c0_64, %c0_65] : memref<128x256xbf16, #tpu.memory_space<vmem>>, vector<128x256xbf16>
    %cst_66 = arith.constant dense<0.000000e+00> : vector<8x256xf32>
    %131 = tpu.matmul %129, %130, %cst_66 {dimension_numbers = #tpu.dot_dimension_numbers<[1], [0], [0], [1], [0, 0, 1, 1], [], []>} : vector<8x128xbf16>, vector<128x256xbf16>, vector<8x256xf32> -> vector<8x256xf32>
    %c0_67 = arith.constant 0 : index
    %c0_68 = arith.constant 0 : index
    %132 = vector.load %arg13[%c0_67, %c0_68] : memref<1x256xf32, #tpu.memory_space<vmem>>, vector<1x256xf32>
    %133 = vector.broadcast %132 : vector<1x256xf32> to vector<8x256xf32>
    %134 = arith.addf %131, %133 : vector<8x256xf32>
    %cst_69 = arith.constant 0.000000e+00 : f32
    %135 = vector.broadcast %cst_69 : f32 to vector<8x256xf32>
    %136 = arith.maximumf %134, %135 : vector<8x256xf32>
    %137 = arith.truncf %136 : vector<8x256xf32> to vector<8x256xbf16>
    %c0_70 = arith.constant 0 : index
    %c0_71 = arith.constant 0 : index
    %138 = vector.load %arg14[%c0_70, %c0_71] : memref<256x128xbf16, #tpu.memory_space<vmem>>, vector<256x128xbf16>
    %cst_72 = arith.constant dense<0.000000e+00> : vector<8x128xf32>
    %139 = tpu.matmul %137, %138, %cst_72 {dimension_numbers = #tpu.dot_dimension_numbers<[1], [0], [0], [1], [0, 0, 1, 1], [], []>} : vector<8x256xbf16>, vector<256x128xbf16>, vector<8x128xf32> -> vector<8x128xf32>
    %c0_73 = arith.constant 0 : index
    %c0_74 = arith.constant 0 : index
    %140 = vector.load %arg15[%c0_73, %c0_74] : memref<1x128xf32, #tpu.memory_space<vmem>>, vector<1x128xf32>
    %141 = vector.broadcast %140 : vector<1x128xf32> to vector<8x128xf32>
    %142 = arith.addf %139, %141 : vector<8x128xf32>
    %143 = arith.addf %128, %142 : vector<8x128xf32>
    %cst_75 = arith.constant dense<0.000000e+00> : vector<8xf32>
    %144 = vector.multi_reduction <add>, %143, %cst_75 [1] : vector<8x128xf32> to vector<8xf32>
    %145 = vector.shape_cast %144 : vector<8xf32> to vector<8x1xf32>
    %cst_76 = arith.constant 1.280000e+02 : f32
    %146 = vector.broadcast %cst_76 : f32 to vector<8x1xf32>
    %147 = arith.divf %145, %146 : vector<8x1xf32>
    %148 = vector.broadcast %147 : vector<8x1xf32> to vector<8x128xf32>
    %149 = arith.subf %143, %148 : vector<8x128xf32>
    %150 = arith.mulf %149, %149 : vector<8x128xf32>
    %cst_77 = arith.constant dense<0.000000e+00> : vector<8xf32>
    %151 = vector.multi_reduction <add>, %150, %cst_77 [1] : vector<8x128xf32> to vector<8xf32>
    %152 = vector.shape_cast %151 : vector<8xf32> to vector<8x1xf32>
    %cst_78 = arith.constant 1.280000e+02 : f32
    %153 = vector.broadcast %cst_78 : f32 to vector<8x1xf32>
    %154 = arith.divf %152, %153 : vector<8x1xf32>
    %155 = vector.broadcast %147 : vector<8x1xf32> to vector<8x128xf32>
    %156 = arith.subf %143, %155 : vector<8x128xf32>
    %cst_79 = arith.constant 9.99999974E-6 : f32
    %157 = vector.broadcast %cst_79 : f32 to vector<8x1xf32>
    %158 = arith.addf %154, %157 : vector<8x1xf32>
    %159 = math.rsqrt %158 : vector<8x1xf32>
    %160 = vector.broadcast %159 : vector<8x1xf32> to vector<8x128xf32>
    %161 = arith.mulf %156, %160 : vector<8x128xf32>
    %c0_80 = arith.constant 0 : index
    %c0_81 = arith.constant 0 : index
    %162 = vector.load %arg16[%c0_80, %c0_81] : memref<1x128xf32, #tpu.memory_space<vmem>>, vector<1x128xf32>
    %163 = vector.broadcast %162 : vector<1x128xf32> to vector<8x128xf32>
    %164 = arith.mulf %161, %163 : vector<8x128xf32>
    %c0_82 = arith.constant 0 : index
    %c0_83 = arith.constant 0 : index
    %165 = vector.load %arg17[%c0_82, %c0_83] : memref<1x128xf32, #tpu.memory_space<vmem>>, vector<1x128xf32>
    %166 = vector.broadcast %165 : vector<1x128xf32> to vector<8x128xf32>
    %167 = arith.addf %164, %166 : vector<8x128xf32>
    %168 = arith.truncf %167 : vector<8x128xf32> to vector<8x128xbf16>
    %c0_84 = arith.constant 0 : index
    %c0_85 = arith.constant 0 : index
    %c0_86 = arith.constant 0 : index
    %169 = vector.load %arg18[%c0_84, %c0_85, %c0_86] : memref<1x8x128xbf16, #tpu.memory_space<vmem>>, vector<1x8x128xbf16>
    %170 = vector.shape_cast %169 : vector<1x8x128xbf16> to vector<8x128xbf16>
    %171 = vector.shape_cast %168 : vector<8x128xbf16> to vector<1x8x128xbf16>
    tpu.vector_store %arg18[%c0_84, %c0_85, %c0_86], %171 {strides = array<i32>} : memref<1x8x128xbf16, #tpu.memory_space<vmem>>, vector<1x8x128xbf16>,
    return
  }
  func.func @transform_0(%arg0: i32, %arg1: i32) -> (i32, i32, i32) {
    %c0_i32 = arith.constant 0 : i32
    %c0_i32_0 = arith.constant 0 : i32
    %c0_i32_1 = arith.constant 0 : i32
    return %arg0, %c0_i32, %c0_i32_0 : i32, i32, i32
  }
  func.func @transform_1(%arg0: i32, %arg1: i32) -> (i32, i32) {
    %c0_i32 = arith.constant 0 : i32
    %c0_i32_0 = arith.constant 0 : i32
    %c0_i32_1 = arith.constant 0 : i32
    return %c0_i32, %c0_i32_0 : i32, i32
  }
  func.func @transform_2(%arg0: i32, %arg1: i32) -> (i32, i32) {
    %c0_i32 = arith.constant 0 : i32
    %c0_i32_0 = arith.constant 0 : i32
    %c0_i32_1 = arith.constant 0 : i32
    return %c0_i32, %c0_i32_0 : i32, i32
  }
  func.func @transform_3(%arg0: i32, %arg1: i32) -> (i32, i32) {
    %c0_i32 = arith.constant 0 : i32
    %c0_i32_0 = arith.constant 0 : i32
    %c0_i32_1 = arith.constant 0 : i32
    return %c0_i32, %c0_i32_0 : i32, i32
  }
  func.func @transform_4(%arg0: i32, %arg1: i32) -> (i32, i32) {
    %c0_i32 = arith.constant 0 : i32
    %c0_i32_0 = arith.constant 0 : i32
    %c0_i32_1 = arith.constant 0 : i32
    return %c0_i32, %c0_i32_0 : i32, i32
  }
  func.func @transform_5(%arg0: i32, %arg1: i32) -> (i32, i32) {
    %c0_i32 = arith.constant 0 : i32
    %c0_i32_0 = arith.constant 0 : i32
    %c0_i32_1 = arith.constant 0 : i32
    return %c0_i32, %c0_i32_0 : i32, i32
  }
  func.func @transform_6(%arg0: i32, %arg1: i32) -> (i32, i32) {
    %c0_i32 = arith.constant 0 : i32
    %c0_i32_0 = arith.constant 0 : i32
    %c0_i32_1 = arith.constant 0 : i32
    return %c0_i32, %c0_i32_0 : i32, i32
  }
  func.func @transform_7(%arg0: i32, %arg1: i32) -> (i32, i32) {
    %c0_i32 = arith.constant 0 : i32
    %c0_i32_0 = arith.constant 0 : i32
    %c0_i32_1 = arith.constant 0 : i32
    return %c0_i32, %c0_i32_0 : i32, i32
  }
  func.func @transform_8(%arg0: i32, %arg1: i32) -> (i32, i32) {
    %c0_i32 = arith.constant 0 : i32
    %c0_i32_0 = arith.constant 0 : i32
    %c0_i32_1 = arith.constant 0 : i32
    return %c0_i32, %c0_i32_0 : i32, i32
  }
  func.func @transform_9(%arg0: i32, %arg1: i32) -> (i32, i32) {
    %c0_i32 = arith.constant 0 : i32
    %c0_i32_0 = arith.constant 0 : i32
    %c0_i32_1 = arith.constant 0 : i32
    return %c0_i32, %c0_i32_0 : i32, i32
  }
  func.func @transform_10(%arg0: i32, %arg1: i32) -> (i32, i32) {
    %c0_i32 = arith.constant 0 : i32
    %c0_i32_0 = arith.constant 0 : i32
    %c0_i32_1 = arith.constant 0 : i32
    return %c0_i32, %c0_i32_0 : i32, i32
  }
  func.func @transform_11(%arg0: i32, %arg1: i32) -> (i32, i32) {
    %c0_i32 = arith.constant 0 : i32
    %c0_i32_0 = arith.constant 0 : i32
    %c0_i32_1 = arith.constant 0 : i32
    return %c0_i32, %c0_i32_0 : i32, i32
  }
  func.func @transform_12(%arg0: i32, %arg1: i32) -> (i32, i32) {
    %c0_i32 = arith.constant 0 : i32
    %c0_i32_0 = arith.constant 0 : i32
    %c0_i32_1 = arith.constant 0 : i32
    return %c0_i32, %c0_i32_0 : i32, i32
  }
  func.func @transform_13(%arg0: i32, %arg1: i32) -> (i32, i32) {
    %c0_i32 = arith.constant 0 : i32
    %c0_i32_0 = arith.constant 0 : i32
    %c0_i32_1 = arith.constant 0 : i32
    return %c0_i32, %c0_i32_0 : i32, i32
  }
  func.func @transform_14(%arg0: i32, %arg1: i32) -> (i32, i32) {
    %c0_i32 = arith.constant 0 : i32
    %c0_i32_0 = arith.constant 0 : i32
    %c0_i32_1 = arith.constant 0 : i32
    return %c0_i32, %c0_i32_0 : i32, i32
  }
  func.func @transform_15(%arg0: i32, %arg1: i32) -> (i32, i32) {
    %c0_i32 = arith.constant 0 : i32
    %c0_i32_0 = arith.constant 0 : i32
    %c0_i32_1 = arith.constant 0 : i32
    return %c0_i32, %c0_i32_0 : i32, i32
  }
  func.func @transform_16(%arg0: i32, %arg1: i32) -> (i32, i32, i32) {
    %c0_i32 = arith.constant 0 : i32
    %c0_i32_0 = arith.constant 0 : i32
    return %arg0, %arg1, %c0_i32 : i32, i32, i32
  }
}

module attributes {stable_mosaic.version = 11 : i64} {
  func.func @encoder_layer_kernel(%arg0: i32, %arg1: i32, %arg2: memref<1x8x128xbf16, #tpu.memory_space<vmem>>, %arg3: memref<128x128xbf16, #tpu.memory_space<vmem>>, %arg4: memref<1x128xf32, #tpu.memory_space<vmem>>, %arg5: memref<128x256xbf16, #tpu.memory_space<vmem>>, %arg6: memref<1x256xf32, #tpu.memory_space<vmem>>, %arg7: memref<128x128xbf16, #tpu.memory_space<vmem>>, %arg8: memref<1x128xf32, #tpu.memory_space<vmem>>, %arg9: memref<1x128xf32, #tpu.memory_space<vmem>>, %arg10: memref<1x128xf32, #tpu.memory_space<vmem>>, %arg11: memref<128x256xbf16, #tpu.memory_space<vmem>>, %arg12: memref<1x256xf32, #tpu.memory_space<vmem>>, %arg13: memref<256x128xbf16, #tpu.memory_space<vmem>>, %arg14: memref<1x128xf32, #tpu.memory_space<vmem>>, %arg15: memref<1x128xf32, #tpu.memory_space<vmem>>, %arg16: memref<1x128xf32, #tpu.memory_space<vmem>>, %arg17: memref<1x8x128xf32, #tpu.memory_space<vmem>>, %arg18: memref<8x128xbf16, #tpu.memory_space<vmem>>, %arg19: memref<8x128xbf16, #tpu.memory_space<vmem>>, %arg20: memref<8x128xbf16, #tpu.memory_space<vmem>>) attributes {dimension_semantics = [#tpu.dimension_semantics<parallel>, #tpu.dimension_semantics<arbitrary>], iteration_bounds = array<i64: 2, 1>, scalar_prefetch = 0 : i64, scratch_operands = 3 : i64, tpu.core_type = #tpu.core_type<tc>, window_params = [{transform_indices = @transform_0, window_bounds = array<i64: 1, 8, 128>}, {pipeline_mode = #tpu.pipeline_mode<synchronous>, transform_indices = @transform_1, window_bounds = array<i64: 128, 128>}, {pipeline_mode = #tpu.pipeline_mode<synchronous>, transform_indices = @transform_2, window_bounds = array<i64: 1, 128>}, {pipeline_mode = #tpu.pipeline_mode<synchronous>, transform_indices = @transform_3, window_bounds = array<i64: 128, 256>}, {pipeline_mode = #tpu.pipeline_mode<synchronous>, transform_indices = @transform_4, window_bounds = array<i64: 1, 256>}, {pipeline_mode = #tpu.pipeline_mode<synchronous>, transform_indices = @transform_5, window_bounds = array<i64: 128, 128>}, {pipeline_mode = #tpu.pipeline_mode<synchronous>, transform_indices = @transform_6, window_bounds = array<i64: 1, 128>}, {pipeline_mode = #tpu.pipeline_mode<synchronous>, transform_indices = @transform_7, window_bounds = array<i64: 1, 128>}, {pipeline_mode = #tpu.pipeline_mode<synchronous>, transform_indices = @transform_8, window_bounds = array<i64: 1, 128>}, {pipeline_mode = #tpu.pipeline_mode<synchronous>, transform_indices = @transform_9, window_bounds = array<i64: 128, 256>}, {pipeline_mode = #tpu.pipeline_mode<synchronous>, transform_indices = @transform_10, window_bounds = array<i64: 1, 256>}, {pipeline_mode = #tpu.pipeline_mode<synchronous>, transform_indices = @transform_11, window_bounds = array<i64: 256, 128>}, {pipeline_mode = #tpu.pipeline_mode<synchronous>, transform_indices = @transform_12, window_bounds = array<i64: 1, 128>}, {pipeline_mode = #tpu.pipeline_mode<synchronous>, transform_indices = @transform_13, window_bounds = array<i64: 1, 128>}, {pipeline_mode = #tpu.pipeline_mode<synchronous>, transform_indices = @transform_14, window_bounds = array<i64: 1, 128>}, {transform_indices = @transform_15, window_bounds = array<i64: 1, 8, 128>}]} {
    %c0_i32 = arith.constant 0 : i32
    %0 = arith.cmpi eq, %arg1, %c0_i32 : i32
    %1 = arith.extui %0 : i1 to i32
    %c0_i32_0 = arith.constant 0 : i32
    %2 = arith.cmpi ne, %1, %c0_i32_0 : i32
    scf.if %2 {
      %c0_86 = arith.constant 0 : index
      %c0_87 = arith.constant 0 : index
      %c0_88 = arith.constant 0 : index
      %169 = vector.load %arg2[%c0_86, %c0_87, %c0_88] : memref<1x8x128xbf16, #tpu.memory_space<vmem>>, vector<1x8x128xbf16>
      %170 = vector.shape_cast %169 : vector<1x8x128xbf16> to vector<8x128xbf16>
      %171 = arith.extf %170 : vector<8x128xbf16> to vector<8x128xf32>
      %172 = arith.truncf %171 : vector<8x128xf32> to vector<8x128xbf16>
      %c0_89 = arith.constant 0 : index
      %c0_90 = arith.constant 0 : index
      %173 = vector.load %arg5[%c0_89, %c0_90] : memref<128x256xbf16, #tpu.memory_space<vmem>>, vector<128x256xbf16>
      %cst_91 = arith.constant dense<0.000000e+00> : vector<8x256xf32>
      %174 = tpu.matmul %172, %173, %cst_91 {dimension_numbers = #tpu.dot_dimension_numbers<[1], [0], [0], [1], [0, 0, 1, 1], [], []>} : vector<8x128xbf16>, vector<128x256xbf16>, vector<8x256xf32> -> vector<8x256xf32>
      %c0_92 = arith.constant 0 : index
      %c0_93 = arith.constant 0 : index
      %175 = vector.load %arg6[%c0_92, %c0_93] : memref<1x256xf32, #tpu.memory_space<vmem>>, vector<1x256xf32>
      %176 = vector.broadcast %175 : vector<1x256xf32> to vector<8x256xf32>
      %177 = arith.addf %174, %176 : vector<8x256xf32>
      %178 = vector.extract_strided_slice %177 {offsets = [0, 0], sizes = [8, 128], strides = [1, 1]} : vector<8x256xf32> to vector<8x128xf32>
      %179 = arith.truncf %178 : vector<8x128xf32> to vector<8x128xbf16>
      %c0_94 = arith.constant 0 : index
      %c0_95 = arith.constant 0 : index
      %180 = vector.load %arg18[%c0_94, %c0_95] : memref<8x128xbf16, #tpu.memory_space<vmem>>, vector<8x128xbf16>
      tpu.vector_store %arg18[%c0_94, %c0_95], %179 {strides = array<i32>} : memref<8x128xbf16, #tpu.memory_space<vmem>>, vector<8x128xbf16>,
      %181 = vector.extract_strided_slice %177 {offsets = [0, 128], sizes = [8, 128], strides = [1, 1]} : vector<8x256xf32> to vector<8x128xf32>
      %182 = arith.truncf %181 : vector<8x128xf32> to vector<8x128xbf16>
      %c0_96 = arith.constant 0 : index
      %c0_97 = arith.constant 0 : index
      %183 = vector.load %arg19[%c0_96, %c0_97] : memref<8x128xbf16, #tpu.memory_space<vmem>>, vector<8x128xbf16>
      tpu.vector_store %arg19[%c0_96, %c0_97], %182 {strides = array<i32>} : memref<8x128xbf16, #tpu.memory_space<vmem>>, vector<8x128xbf16>,
    } else {
    }
    %c8_i32 = arith.constant 8 : i32
    %3 = arith.muli %arg1, %c8_i32 : i32
    %4 = tpu.assume_multiple %3, 8 : i32
    %c0 = arith.constant 0 : index
    %5 = arith.index_cast %4 : i32 to index
    %c0_1 = arith.constant 0 : index
    %6 = vector.load %arg2[%c0, %5, %c0_1] : memref<1x8x128xbf16, #tpu.memory_space<vmem>>, vector<1x8x128xbf16>
    %7 = vector.shape_cast %6 : vector<1x8x128xbf16> to vector<8x128xbf16>
    %8 = arith.extf %7 : vector<8x128xbf16> to vector<8x128xf32>
    %9 = arith.truncf %8 : vector<8x128xf32> to vector<8x128xbf16>
    %c0_2 = arith.constant 0 : index
    %c0_3 = arith.constant 0 : index
    %10 = vector.load %arg3[%c0_2, %c0_3] : memref<128x128xbf16, #tpu.memory_space<vmem>>, vector<128x128xbf16>
    %cst = arith.constant dense<0.000000e+00> : vector<8x128xf32>
    %11 = tpu.matmul %9, %10, %cst {dimension_numbers = #tpu.dot_dimension_numbers<[1], [0], [0], [1], [0, 0, 1, 1], [], []>} : vector<8x128xbf16>, vector<128x128xbf16>, vector<8x128xf32> -> vector<8x128xf32>
    %c0_4 = arith.constant 0 : index
    %c0_5 = arith.constant 0 : index
    %12 = vector.load %arg4[%c0_4, %c0_5] : memref<1x128xf32, #tpu.memory_space<vmem>>, vector<1x128xf32>
    %13 = vector.broadcast %12 : vector<1x128xf32> to vector<8x128xf32>
    %14 = arith.addf %11, %13 : vector<8x128xf32>
    %15 = arith.truncf %14 : vector<8x128xf32> to vector<8x128xbf16>
    %16 = vector.extract_strided_slice %15 {offsets = [0, 0], sizes = [8, 32], strides = [1, 1]} : vector<8x128xbf16> to vector<8x32xbf16>
    %c0_6 = arith.constant 0 : index
    %c0_7 = arith.constant 0 : index
    %17 = vector.load %arg18[%c0_6, %c0_7] : memref<8x128xbf16, #tpu.memory_space<vmem>>, vector<8x32xbf16>
    %cst_8 = arith.constant dense<0.000000e+00> : vector<8x8xf32>
    %18 = tpu.matmul %16, %17, %cst_8 {dimension_numbers = #tpu.dot_dimension_numbers<[1], [1], [0], [0], [0, 0, 1, 0], [], []>} : vector<8x32xbf16>, vector<8x32xbf16>, vector<8x8xf32> -> vector<8x8xf32>
    %cst_9 = arith.constant 0.176776692 : f32
    %19 = vector.broadcast %cst_9 : f32 to vector<8x8xf32>
    %20 = arith.mulf %18, %19 : vector<8x8xf32>
    %cst_10 = arith.constant dense<0xFF800000> : vector<8xf32>
    %21 = vector.multi_reduction <maximumf>, %20, %cst_10 [1] : vector<8x8xf32> to vector<8xf32>
    %22 = vector.shape_cast %21 : vector<8xf32> to vector<8x1xf32>
    %23 = vector.broadcast %22 : vector<8x1xf32> to vector<8x8xf32>
    %24 = arith.subf %20, %23 : vector<8x8xf32>
    %25 = math.exp %24 : vector<8x8xf32>
    %cst_11 = arith.constant dense<0.000000e+00> : vector<8xf32>
    %26 = vector.multi_reduction <add>, %25, %cst_11 [1] : vector<8x8xf32> to vector<8xf32>
    %27 = vector.shape_cast %26 : vector<8xf32> to vector<8x1xf32>
    %28 = arith.truncf %25 : vector<8x8xf32> to vector<8x8xbf16>
    %c0_12 = arith.constant 0 : index
    %c0_13 = arith.constant 0 : index
    %29 = vector.load %arg19[%c0_12, %c0_13] : memref<8x128xbf16, #tpu.memory_space<vmem>>, vector<8x32xbf16>
    %cst_14 = arith.constant dense<0.000000e+00> : vector<8x32xf32>
    %30 = tpu.matmul %28, %29, %cst_14 {dimension_numbers = #tpu.dot_dimension_numbers<[1], [0], [0], [1], [0, 0, 1, 1], [], []>} : vector<8x8xbf16>, vector<8x32xbf16>, vector<8x32xf32> -> vector<8x32xf32>
    %31 = tpu.reciprocal %27 {approx = true} : vector<8x1xf32> -> vector<8x1xf32>
    %32 = vector.broadcast %31 : vector<8x1xf32> to vector<8x32xf32>
    %33 = arith.mulf %30, %32 : vector<8x32xf32>
    %34 = arith.truncf %33 : vector<8x32xf32> to vector<8x32xbf16>
    %c0_15 = arith.constant 0 : index
    %c0_16 = arith.constant 0 : index
    %35 = vector.load %arg20[%c0_15, %c0_16] : memref<8x128xbf16, #tpu.memory_space<vmem>>, vector<8x32xbf16>
    tpu.vector_store %arg20[%c0_15, %c0_16], %34 {strides = array<i32>} : memref<8x128xbf16, #tpu.memory_space<vmem>>, vector<8x32xbf16>,
    %36 = vector.extract_strided_slice %15 {offsets = [0, 32], sizes = [8, 32], strides = [1, 1]} : vector<8x128xbf16> to vector<8x32xbf16>
    %c0_17 = arith.constant 0 : index
    %c32 = arith.constant 32 : index
    %37 = vector.load %arg18[%c0_17, %c32] : memref<8x128xbf16, #tpu.memory_space<vmem>>, vector<8x32xbf16>
    %cst_18 = arith.constant dense<0.000000e+00> : vector<8x8xf32>
    %38 = tpu.matmul %36, %37, %cst_18 {dimension_numbers = #tpu.dot_dimension_numbers<[1], [1], [0], [0], [0, 0, 1, 0], [], []>} : vector<8x32xbf16>, vector<8x32xbf16>, vector<8x8xf32> -> vector<8x8xf32>
    %cst_19 = arith.constant 0.176776692 : f32
    %39 = vector.broadcast %cst_19 : f32 to vector<8x8xf32>
    %40 = arith.mulf %38, %39 : vector<8x8xf32>
    %cst_20 = arith.constant dense<0xFF800000> : vector<8xf32>
    %41 = vector.multi_reduction <maximumf>, %40, %cst_20 [1] : vector<8x8xf32> to vector<8xf32>
    %42 = vector.shape_cast %41 : vector<8xf32> to vector<8x1xf32>
    %43 = vector.broadcast %42 : vector<8x1xf32> to vector<8x8xf32>
    %44 = arith.subf %40, %43 : vector<8x8xf32>
    %45 = math.exp %44 : vector<8x8xf32>
    %cst_21 = arith.constant dense<0.000000e+00> : vector<8xf32>
    %46 = vector.multi_reduction <add>, %45, %cst_21 [1] : vector<8x8xf32> to vector<8xf32>
    %47 = vector.shape_cast %46 : vector<8xf32> to vector<8x1xf32>
    %48 = arith.truncf %45 : vector<8x8xf32> to vector<8x8xbf16>
    %c0_22 = arith.constant 0 : index
    %c32_23 = arith.constant 32 : index
    %49 = vector.load %arg19[%c0_22, %c32_23] : memref<8x128xbf16, #tpu.memory_space<vmem>>, vector<8x32xbf16>
    %cst_24 = arith.constant dense<0.000000e+00> : vector<8x32xf32>
    %50 = tpu.matmul %48, %49, %cst_24 {dimension_numbers = #tpu.dot_dimension_numbers<[1], [0], [0], [1], [0, 0, 1, 1], [], []>} : vector<8x8xbf16>, vector<8x32xbf16>, vector<8x32xf32> -> vector<8x32xf32>
    %51 = tpu.reciprocal %47 {approx = true} : vector<8x1xf32> -> vector<8x1xf32>
    %52 = vector.broadcast %51 : vector<8x1xf32> to vector<8x32xf32>
    %53 = arith.mulf %50, %52 : vector<8x32xf32>
    %54 = arith.truncf %53 : vector<8x32xf32> to vector<8x32xbf16>
    %c0_25 = arith.constant 0 : index
    %c32_26 = arith.constant 32 : index
    %55 = vector.load %arg20[%c0_25, %c32_26] : memref<8x128xbf16, #tpu.memory_space<vmem>>, vector<8x32xbf16>
    tpu.vector_store %arg20[%c0_25, %c32_26], %54 {strides = array<i32>} : memref<8x128xbf16, #tpu.memory_space<vmem>>, vector<8x32xbf16>,
    %56 = vector.extract_strided_slice %15 {offsets = [0, 64], sizes = [8, 32], strides = [1, 1]} : vector<8x128xbf16> to vector<8x32xbf16>
    %c0_27 = arith.constant 0 : index
    %c64 = arith.constant 64 : index
    %57 = vector.load %arg18[%c0_27, %c64] : memref<8x128xbf16, #tpu.memory_space<vmem>>, vector<8x32xbf16>
    %cst_28 = arith.constant dense<0.000000e+00> : vector<8x8xf32>
    %58 = tpu.matmul %56, %57, %cst_28 {dimension_numbers = #tpu.dot_dimension_numbers<[1], [1], [0], [0], [0, 0, 1, 0], [], []>} : vector<8x32xbf16>, vector<8x32xbf16>, vector<8x8xf32> -> vector<8x8xf32>
    %cst_29 = arith.constant 0.176776692 : f32
    %59 = vector.broadcast %cst_29 : f32 to vector<8x8xf32>
    %60 = arith.mulf %58, %59 : vector<8x8xf32>
    %cst_30 = arith.constant dense<0xFF800000> : vector<8xf32>
    %61 = vector.multi_reduction <maximumf>, %60, %cst_30 [1] : vector<8x8xf32> to vector<8xf32>
    %62 = vector.shape_cast %61 : vector<8xf32> to vector<8x1xf32>
    %63 = vector.broadcast %62 : vector<8x1xf32> to vector<8x8xf32>
    %64 = arith.subf %60, %63 : vector<8x8xf32>
    %65 = math.exp %64 : vector<8x8xf32>
    %cst_31 = arith.constant dense<0.000000e+00> : vector<8xf32>
    %66 = vector.multi_reduction <add>, %65, %cst_31 [1] : vector<8x8xf32> to vector<8xf32>
    %67 = vector.shape_cast %66 : vector<8xf32> to vector<8x1xf32>
    %68 = arith.truncf %65 : vector<8x8xf32> to vector<8x8xbf16>
    %c0_32 = arith.constant 0 : index
    %c64_33 = arith.constant 64 : index
    %69 = vector.load %arg19[%c0_32, %c64_33] : memref<8x128xbf16, #tpu.memory_space<vmem>>, vector<8x32xbf16>
    %cst_34 = arith.constant dense<0.000000e+00> : vector<8x32xf32>
    %70 = tpu.matmul %68, %69, %cst_34 {dimension_numbers = #tpu.dot_dimension_numbers<[1], [0], [0], [1], [0, 0, 1, 1], [], []>} : vector<8x8xbf16>, vector<8x32xbf16>, vector<8x32xf32> -> vector<8x32xf32>
    %71 = tpu.reciprocal %67 {approx = true} : vector<8x1xf32> -> vector<8x1xf32>
    %72 = vector.broadcast %71 : vector<8x1xf32> to vector<8x32xf32>
    %73 = arith.mulf %70, %72 : vector<8x32xf32>
    %74 = arith.truncf %73 : vector<8x32xf32> to vector<8x32xbf16>
    %c0_35 = arith.constant 0 : index
    %c64_36 = arith.constant 64 : index
    %75 = vector.load %arg20[%c0_35, %c64_36] : memref<8x128xbf16, #tpu.memory_space<vmem>>, vector<8x32xbf16>
    tpu.vector_store %arg20[%c0_35, %c64_36], %74 {strides = array<i32>} : memref<8x128xbf16, #tpu.memory_space<vmem>>, vector<8x32xbf16>,
    %76 = vector.extract_strided_slice %15 {offsets = [0, 96], sizes = [8, 32], strides = [1, 1]} : vector<8x128xbf16> to vector<8x32xbf16>
    %c0_37 = arith.constant 0 : index
    %c96 = arith.constant 96 : index
    %77 = vector.load %arg18[%c0_37, %c96] : memref<8x128xbf16, #tpu.memory_space<vmem>>, vector<8x32xbf16>
    %cst_38 = arith.constant dense<0.000000e+00> : vector<8x8xf32>
    %78 = tpu.matmul %76, %77, %cst_38 {dimension_numbers = #tpu.dot_dimension_numbers<[1], [1], [0], [0], [0, 0, 1, 0], [], []>} : vector<8x32xbf16>, vector<8x32xbf16>, vector<8x8xf32> -> vector<8x8xf32>
    %cst_39 = arith.constant 0.176776692 : f32
    %79 = vector.broadcast %cst_39 : f32 to vector<8x8xf32>
    %80 = arith.mulf %78, %79 : vector<8x8xf32>
    %cst_40 = arith.constant dense<0xFF800000> : vector<8xf32>
    %81 = vector.multi_reduction <maximumf>, %80, %cst_40 [1] : vector<8x8xf32> to vector<8xf32>
    %82 = vector.shape_cast %81 : vector<8xf32> to vector<8x1xf32>
    %83 = vector.broadcast %82 : vector<8x1xf32> to vector<8x8xf32>
    %84 = arith.subf %80, %83 : vector<8x8xf32>
    %85 = math.exp %84 : vector<8x8xf32>
    %cst_41 = arith.constant dense<0.000000e+00> : vector<8xf32>
    %86 = vector.multi_reduction <add>, %85, %cst_41 [1] : vector<8x8xf32> to vector<8xf32>
    %87 = vector.shape_cast %86 : vector<8xf32> to vector<8x1xf32>
    %88 = arith.truncf %85 : vector<8x8xf32> to vector<8x8xbf16>
    %c0_42 = arith.constant 0 : index
    %c96_43 = arith.constant 96 : index
    %89 = vector.load %arg19[%c0_42, %c96_43] : memref<8x128xbf16, #tpu.memory_space<vmem>>, vector<8x32xbf16>
    %cst_44 = arith.constant dense<0.000000e+00> : vector<8x32xf32>
    %90 = tpu.matmul %88, %89, %cst_44 {dimension_numbers = #tpu.dot_dimension_numbers<[1], [0], [0], [1], [0, 0, 1, 1], [], []>} : vector<8x8xbf16>, vector<8x32xbf16>, vector<8x32xf32> -> vector<8x32xf32>
    %91 = tpu.reciprocal %87 {approx = true} : vector<8x1xf32> -> vector<8x1xf32>
    %92 = vector.broadcast %91 : vector<8x1xf32> to vector<8x32xf32>
    %93 = arith.mulf %90, %92 : vector<8x32xf32>
    %94 = arith.truncf %93 : vector<8x32xf32> to vector<8x32xbf16>
    %c0_45 = arith.constant 0 : index
    %c96_46 = arith.constant 96 : index
    %95 = vector.load %arg20[%c0_45, %c96_46] : memref<8x128xbf16, #tpu.memory_space<vmem>>, vector<8x32xbf16>
    tpu.vector_store %arg20[%c0_45, %c96_46], %94 {strides = array<i32>} : memref<8x128xbf16, #tpu.memory_space<vmem>>, vector<8x32xbf16>,
    %c0_47 = arith.constant 0 : index
    %c0_48 = arith.constant 0 : index
    %96 = vector.load %arg20[%c0_47, %c0_48] : memref<8x128xbf16, #tpu.memory_space<vmem>>, vector<8x128xbf16>
    %c0_49 = arith.constant 0 : index
    %c0_50 = arith.constant 0 : index
    %97 = vector.load %arg7[%c0_49, %c0_50] : memref<128x128xbf16, #tpu.memory_space<vmem>>, vector<128x128xbf16>
    %cst_51 = arith.constant dense<0.000000e+00> : vector<8x128xf32>
    %98 = tpu.matmul %96, %97, %cst_51 {dimension_numbers = #tpu.dot_dimension_numbers<[1], [0], [0], [1], [0, 0, 1, 1], [], []>} : vector<8x128xbf16>, vector<128x128xbf16>, vector<8x128xf32> -> vector<8x128xf32>
    %c0_52 = arith.constant 0 : index
    %c0_53 = arith.constant 0 : index
    %99 = vector.load %arg8[%c0_52, %c0_53] : memref<1x128xf32, #tpu.memory_space<vmem>>, vector<1x128xf32>
    %100 = vector.broadcast %99 : vector<1x128xf32> to vector<8x128xf32>
    %101 = arith.addf %98, %100 : vector<8x128xf32>
    %102 = arith.addf %8, %101 : vector<8x128xf32>
    %cst_54 = arith.constant dense<0.000000e+00> : vector<8xf32>
    %103 = vector.multi_reduction <add>, %102, %cst_54 [1] : vector<8x128xf32> to vector<8xf32>
    %104 = vector.shape_cast %103 : vector<8xf32> to vector<8x1xf32>
    %cst_55 = arith.constant 1.280000e+02 : f32
    %105 = vector.broadcast %cst_55 : f32 to vector<8x1xf32>
    %106 = arith.divf %104, %105 : vector<8x1xf32>
    %107 = vector.broadcast %106 : vector<8x1xf32> to vector<8x128xf32>
    %108 = arith.subf %102, %107 : vector<8x128xf32>
    %109 = arith.mulf %108, %108 : vector<8x128xf32>
    %cst_56 = arith.constant dense<0.000000e+00> : vector<8xf32>
    %110 = vector.multi_reduction <add>, %109, %cst_56 [1] : vector<8x128xf32> to vector<8xf32>
    %111 = vector.shape_cast %110 : vector<8xf32> to vector<8x1xf32>
    %cst_57 = arith.constant 1.280000e+02 : f32
    %112 = vector.broadcast %cst_57 : f32 to vector<8x1xf32>
    %113 = arith.divf %111, %112 : vector<8x1xf32>
    %114 = vector.broadcast %106 : vector<8x1xf32> to vector<8x128xf32>
    %115 = arith.subf %102, %114 : vector<8x128xf32>
    %cst_58 = arith.constant 9.99999974E-6 : f32
    %116 = vector.broadcast %cst_58 : f32 to vector<8x1xf32>
    %117 = arith.addf %113, %116 : vector<8x1xf32>
    %118 = math.rsqrt %117 : vector<8x1xf32>
    %119 = vector.broadcast %118 : vector<8x1xf32> to vector<8x128xf32>
    %120 = arith.mulf %115, %119 : vector<8x128xf32>
    %c0_59 = arith.constant 0 : index
    %c0_60 = arith.constant 0 : index
    %121 = vector.load %arg9[%c0_59, %c0_60] : memref<1x128xf32, #tpu.memory_space<vmem>>, vector<1x128xf32>
    %122 = vector.broadcast %121 : vector<1x128xf32> to vector<8x128xf32>
    %123 = arith.mulf %120, %122 : vector<8x128xf32>
    %c0_61 = arith.constant 0 : index
    %c0_62 = arith.constant 0 : index
    %124 = vector.load %arg10[%c0_61, %c0_62] : memref<1x128xf32, #tpu.memory_space<vmem>>, vector<1x128xf32>
    %125 = vector.broadcast %124 : vector<1x128xf32> to vector<8x128xf32>
    %126 = arith.addf %123, %125 : vector<8x128xf32>
    %127 = arith.truncf %126 : vector<8x128xf32> to vector<8x128xbf16>
    %c0_63 = arith.constant 0 : index
    %c0_64 = arith.constant 0 : index
    %128 = vector.load %arg11[%c0_63, %c0_64] : memref<128x256xbf16, #tpu.memory_space<vmem>>, vector<128x256xbf16>
    %cst_65 = arith.constant dense<0.000000e+00> : vector<8x256xf32>
    %129 = tpu.matmul %127, %128, %cst_65 {dimension_numbers = #tpu.dot_dimension_numbers<[1], [0], [0], [1], [0, 0, 1, 1], [], []>} : vector<8x128xbf16>, vector<128x256xbf16>, vector<8x256xf32> -> vector<8x256xf32>
    %c0_66 = arith.constant 0 : index
    %c0_67 = arith.constant 0 : index
    %130 = vector.load %arg12[%c0_66, %c0_67] : memref<1x256xf32, #tpu.memory_space<vmem>>, vector<1x256xf32>
    %131 = vector.broadcast %130 : vector<1x256xf32> to vector<8x256xf32>
    %132 = arith.addf %129, %131 : vector<8x256xf32>
    %cst_68 = arith.constant 0.000000e+00 : f32
    %133 = vector.broadcast %cst_68 : f32 to vector<8x256xf32>
    %134 = arith.maximumf %132, %133 : vector<8x256xf32>
    %135 = arith.truncf %134 : vector<8x256xf32> to vector<8x256xbf16>
    %c0_69 = arith.constant 0 : index
    %c0_70 = arith.constant 0 : index
    %136 = vector.load %arg13[%c0_69, %c0_70] : memref<256x128xbf16, #tpu.memory_space<vmem>>, vector<256x128xbf16>
    %cst_71 = arith.constant dense<0.000000e+00> : vector<8x128xf32>
    %137 = tpu.matmul %135, %136, %cst_71 {dimension_numbers = #tpu.dot_dimension_numbers<[1], [0], [0], [1], [0, 0, 1, 1], [], []>} : vector<8x256xbf16>, vector<256x128xbf16>, vector<8x128xf32> -> vector<8x128xf32>
    %c0_72 = arith.constant 0 : index
    %c0_73 = arith.constant 0 : index
    %138 = vector.load %arg14[%c0_72, %c0_73] : memref<1x128xf32, #tpu.memory_space<vmem>>, vector<1x128xf32>
    %139 = vector.broadcast %138 : vector<1x128xf32> to vector<8x128xf32>
    %140 = arith.addf %137, %139 : vector<8x128xf32>
    %141 = arith.addf %126, %140 : vector<8x128xf32>
    %cst_74 = arith.constant dense<0.000000e+00> : vector<8xf32>
    %142 = vector.multi_reduction <add>, %141, %cst_74 [1] : vector<8x128xf32> to vector<8xf32>
    %143 = vector.shape_cast %142 : vector<8xf32> to vector<8x1xf32>
    %cst_75 = arith.constant 1.280000e+02 : f32
    %144 = vector.broadcast %cst_75 : f32 to vector<8x1xf32>
    %145 = arith.divf %143, %144 : vector<8x1xf32>
    %146 = vector.broadcast %145 : vector<8x1xf32> to vector<8x128xf32>
    %147 = arith.subf %141, %146 : vector<8x128xf32>
    %148 = arith.mulf %147, %147 : vector<8x128xf32>
    %cst_76 = arith.constant dense<0.000000e+00> : vector<8xf32>
    %149 = vector.multi_reduction <add>, %148, %cst_76 [1] : vector<8x128xf32> to vector<8xf32>
    %150 = vector.shape_cast %149 : vector<8xf32> to vector<8x1xf32>
    %cst_77 = arith.constant 1.280000e+02 : f32
    %151 = vector.broadcast %cst_77 : f32 to vector<8x1xf32>
    %152 = arith.divf %150, %151 : vector<8x1xf32>
    %153 = vector.broadcast %145 : vector<8x1xf32> to vector<8x128xf32>
    %154 = arith.subf %141, %153 : vector<8x128xf32>
    %cst_78 = arith.constant 9.99999974E-6 : f32
    %155 = vector.broadcast %cst_78 : f32 to vector<8x1xf32>
    %156 = arith.addf %152, %155 : vector<8x1xf32>
    %157 = math.rsqrt %156 : vector<8x1xf32>
    %158 = vector.broadcast %157 : vector<8x1xf32> to vector<8x128xf32>
    %159 = arith.mulf %154, %158 : vector<8x128xf32>
    %c0_79 = arith.constant 0 : index
    %c0_80 = arith.constant 0 : index
    %160 = vector.load %arg15[%c0_79, %c0_80] : memref<1x128xf32, #tpu.memory_space<vmem>>, vector<1x128xf32>
    %161 = vector.broadcast %160 : vector<1x128xf32> to vector<8x128xf32>
    %162 = arith.mulf %159, %161 : vector<8x128xf32>
    %c0_81 = arith.constant 0 : index
    %c0_82 = arith.constant 0 : index
    %163 = vector.load %arg16[%c0_81, %c0_82] : memref<1x128xf32, #tpu.memory_space<vmem>>, vector<1x128xf32>
    %164 = vector.broadcast %163 : vector<1x128xf32> to vector<8x128xf32>
    %165 = arith.addf %162, %164 : vector<8x128xf32>
    %c0_83 = arith.constant 0 : index
    %c0_84 = arith.constant 0 : index
    %c0_85 = arith.constant 0 : index
    %166 = vector.load %arg17[%c0_83, %c0_84, %c0_85] : memref<1x8x128xf32, #tpu.memory_space<vmem>>, vector<1x8x128xf32>
    %167 = vector.shape_cast %166 : vector<1x8x128xf32> to vector<8x128xf32>
    %168 = vector.shape_cast %165 : vector<8x128xf32> to vector<1x8x128xf32>
    tpu.vector_store %arg17[%c0_83, %c0_84, %c0_85], %168 {strides = array<i32>} : memref<1x8x128xf32, #tpu.memory_space<vmem>>, vector<1x8x128xf32>,
    return
  }
  func.func @transform_0(%arg0: i32, %arg1: i32) -> (i32, i32, i32) {
    %c0_i32 = arith.constant 0 : i32
    %c0_i32_0 = arith.constant 0 : i32
    %c0_i32_1 = arith.constant 0 : i32
    return %arg0, %c0_i32, %c0_i32_0 : i32, i32, i32
  }
  func.func @transform_1(%arg0: i32, %arg1: i32) -> (i32, i32) {
    %c0_i32 = arith.constant 0 : i32
    %c0_i32_0 = arith.constant 0 : i32
    %c0_i32_1 = arith.constant 0 : i32
    return %c0_i32, %c0_i32_0 : i32, i32
  }
  func.func @transform_2(%arg0: i32, %arg1: i32) -> (i32, i32) {
    %c0_i32 = arith.constant 0 : i32
    %c0_i32_0 = arith.constant 0 : i32
    %c0_i32_1 = arith.constant 0 : i32
    return %c0_i32, %c0_i32_0 : i32, i32
  }
  func.func @transform_3(%arg0: i32, %arg1: i32) -> (i32, i32) {
    %c0_i32 = arith.constant 0 : i32
    %c0_i32_0 = arith.constant 0 : i32
    %c0_i32_1 = arith.constant 0 : i32
    return %c0_i32, %c0_i32_0 : i32, i32
  }
  func.func @transform_4(%arg0: i32, %arg1: i32) -> (i32, i32) {
    %c0_i32 = arith.constant 0 : i32
    %c0_i32_0 = arith.constant 0 : i32
    %c0_i32_1 = arith.constant 0 : i32
    return %c0_i32, %c0_i32_0 : i32, i32
  }
  func.func @transform_5(%arg0: i32, %arg1: i32) -> (i32, i32) {
    %c0_i32 = arith.constant 0 : i32
    %c0_i32_0 = arith.constant 0 : i32
    %c0_i32_1 = arith.constant 0 : i32
    return %c0_i32, %c0_i32_0 : i32, i32
  }
  func.func @transform_6(%arg0: i32, %arg1: i32) -> (i32, i32) {
    %c0_i32 = arith.constant 0 : i32
    %c0_i32_0 = arith.constant 0 : i32
    %c0_i32_1 = arith.constant 0 : i32
    return %c0_i32, %c0_i32_0 : i32, i32
  }
  func.func @transform_7(%arg0: i32, %arg1: i32) -> (i32, i32) {
    %c0_i32 = arith.constant 0 : i32
    %c0_i32_0 = arith.constant 0 : i32
    %c0_i32_1 = arith.constant 0 : i32
    return %c0_i32, %c0_i32_0 : i32, i32
  }
  func.func @transform_8(%arg0: i32, %arg1: i32) -> (i32, i32) {
    %c0_i32 = arith.constant 0 : i32
    %c0_i32_0 = arith.constant 0 : i32
    %c0_i32_1 = arith.constant 0 : i32
    return %c0_i32, %c0_i32_0 : i32, i32
  }
  func.func @transform_9(%arg0: i32, %arg1: i32) -> (i32, i32) {
    %c0_i32 = arith.constant 0 : i32
    %c0_i32_0 = arith.constant 0 : i32
    %c0_i32_1 = arith.constant 0 : i32
    return %c0_i32, %c0_i32_0 : i32, i32
  }
  func.func @transform_10(%arg0: i32, %arg1: i32) -> (i32, i32) {
    %c0_i32 = arith.constant 0 : i32
    %c0_i32_0 = arith.constant 0 : i32
    %c0_i32_1 = arith.constant 0 : i32
    return %c0_i32, %c0_i32_0 : i32, i32
  }
  func.func @transform_11(%arg0: i32, %arg1: i32) -> (i32, i32) {
    %c0_i32 = arith.constant 0 : i32
    %c0_i32_0 = arith.constant 0 : i32
    %c0_i32_1 = arith.constant 0 : i32
    return %c0_i32, %c0_i32_0 : i32, i32
  }
  func.func @transform_12(%arg0: i32, %arg1: i32) -> (i32, i32) {
    %c0_i32 = arith.constant 0 : i32
    %c0_i32_0 = arith.constant 0 : i32
    %c0_i32_1 = arith.constant 0 : i32
    return %c0_i32, %c0_i32_0 : i32, i32
  }
  func.func @transform_13(%arg0: i32, %arg1: i32) -> (i32, i32) {
    %c0_i32 = arith.constant 0 : i32
    %c0_i32_0 = arith.constant 0 : i32
    %c0_i32_1 = arith.constant 0 : i32
    return %c0_i32, %c0_i32_0 : i32, i32
  }
  func.func @transform_14(%arg0: i32, %arg1: i32) -> (i32, i32) {
    %c0_i32 = arith.constant 0 : i32
    %c0_i32_0 = arith.constant 0 : i32
    %c0_i32_1 = arith.constant 0 : i32
    return %c0_i32, %c0_i32_0 : i32, i32
  }
  func.func @transform_15(%arg0: i32, %arg1: i32) -> (i32, i32, i32) {
    %c0_i32 = arith.constant 0 : i32
    %c0_i32_0 = arith.constant 0 : i32
    return %arg0, %arg1, %c0_i32 : i32, i32, i32
  }
}

</mosaic_0001>

<bundles_post_ra>
// kernel: encoder_forward.3
= control target key start
LH: loop header
LB: loop body
LE: loop exit
PB: predicated region body
PF: predicated region fallthrough
CT: control target
= control target key end

     0   :  { %s2876_s0 = inlined_call_operand.vmem [shape: bf16[2,8,128], index: 0, kind: input, shape index: {}]   ;;  %s2877_s1 = inlined_call_operand.vmem [shape: bf16[128,128], index: 1, kind: input, shape index: {}]   ;;  %s2878_s2 = inlined_call_operand.vmem [shape: f32[1,128], index: 2, kind: input, shape index: {}]   ;;  %s2879_s3 = inlined_call_operand.vmem [shape: bf16[128,256], index: 3, kind: input, shape index: {}]   ;;  %s2880_s4 = inlined_call_operand.vmem [shape: f32[1,256], index: 4, kind: input, shape index: {}]   ;;  %s2881_s5 = inlined_call_operand.vmem [shape: bf16[128,128], index: 5, kind: input, shape index: {}]   ;;  %s2882_s6 = inlined_call_operand.vmem [shape: f32[1,128], index: 6, kind: input, shape index: {}]   ;;  %s2883_s7 = inlined_call_operand.vmem [shape: f32[1,128], index: 7, kind: input, shape index: {}]   ;;  %s2884_s8 = inlined_call_operand.vmem [shape: f32[1,128], index: 8, kind: input, shape index: {}]   ;;  %s2885_s9 = inlined_call_operand.vmem [shape: bf16[128,256], index: 9, kind: input, shape index: {}]   ;;  %s2886_s10 = inlined_call_operand.vmem [shape: f32[1,256], index: 10, kind: input, shape index: {}]   ;;  %s2887_s11 = inlined_call_operand.vmem [shape: bf16[256,128], index: 11, kind: input, shape index: {}]   ;;  %s2888_s12 = inlined_call_operand.vmem [shape: f32[1,128], index: 12, kind: input, shape index: {}]   ;;  %s2889_s13 = inlined_call_operand.vmem [shape: f32[1,128], index: 13, kind: input, shape index: {}]   ;;  %s2890_s14 = inlined_call_operand.vmem [shape: f32[1,128], index: 14, kind: input, shape index: {}]   ;;  %s2891_s15 = inlined_call_operand.hbm [shape: f32[2,8,128], index: 15, kind: output, shape index: {}]  }
   0x1   :  { %2897 = sst [smem:[#allocation13_spill]] %s2876_s0 }
   0x2   :  { %2898 = sst [smem:[#allocation14_spill]] %s2877_s1 }
   0x3   :  { %2899 = sst [smem:[#allocation15_spill]] %s2891_s15 }
   0x4   :  { %20 = vsyncpa [#allocation6], 0 }
   0x5   :  { %22 = vsyncpa [#allocation6 + $0x1], 0  ;;  %s2444_s18 = smov 0   ;;  %s2446_s19 = smov 0  }
   0x6   :  { %s2448_s20 = smov 0   ;;  %s2450_s21 = smov 0  }
   0x7   :  { %s2452_s22 = smov 0   ;;  %s2454_s23 = smov 0  }
   0x8 LB: > { %2900 = sst [smem:[#allocation8_spill]] %s2335_s18  ;;  %s1864_s24 = sadd.s32 4294967295, %s2355_s23   ;;  %s2355_s23 = sphi %s2454_s23, %s28_s23   ;;  %s2351_s22 = sphi %s2452_s22, %s2914_s22   ;;  %s2347_s21 = sphi %s2450_s21, %s2913_s21   ;;  %s2343_s20 = sphi %s2448_s20, %s2912_s20   ;;  %s2339_s19 = sphi %s2446_s19, %s2916_s19   ;;  %s2335_s18 = sphi %s2444_s18, %s2915_s18  }
   0x9   : > { %2901 = sst [smem:[#allocation9_spill]] %s2343_s20  ;;  %s1865_s25 = sadd.s32 4294967294, %s2355_s23  }
   0xa   : > { %2902 = sst [smem:[#allocation10_spill]] %s2351_s22  ;;  %s40_s26 = sadd.s32 1, %s2351_s22 }
   0xb   : > { %s369_s27 = sadd.s32 1, %s2343_s20  ;;  %p42_p0 = scmp.ge.s32.totalorder %s40_s26, 2 }
   0xc   : > { %p379_p1 = scmp.ne.s32.totalorder %s2343_s20, %s2339_s19  ;;  %p380_p2 = scmp.eq.s32.totalorder %s1864_s24, 1 }
   0xd   : > { %p385_p3 = scmp.ne.s32.totalorder %s2339_s19, %s2335_s18  ;;  %s2918_s26 = smov (%p42_p0, %s40_s26), 0 }
   0xe   : > { %2903 = sst [smem:[#allocation11_spill]] %s2918_s26  ;;  %p2484_p4 = por %p380_p2, %p379_p1 }
   0xf   : > { %p386_p5 = scmp.eq.s32.totalorder %s1865_s25, 1  ;;  %s364_s29 = ssub.s32 %s2351_s22, %s2918_s26 }
  0x10   : > { %p1868_p6 = scmp.ge.s32.totalorder %s2355_s23, 1  ;;  %p367_p7 = scmp.eq.s32.totalorder %s364_s29, 0 }
  0x11   : > { %p2491_p8 = por %p386_p5, %p385_p3  ;;  %p453_p9 = scmp.lt.s32.totalorder %s2355_s23, 3 }
  0x12   : > { %s2497_s16 = scalar_select %p367_p7, %s2343_s20, %s369_s27  }
  0x13   : > { %p454_p10 = pnand %p1868_p6, %p453_p9 }
  0x14   : > { %2906 = sst [smem:[#allocation12_spill]] %s2497_s16  ;;  %v2171_v0 = vld [vmem:[%s2879_s3 + $0x4] ss:$8 sps:$4 sm:$0xff] (!%p454_p10)   ;;  %v2173_v1 = vld [vmem:[%s2879_s3] ss:$8 sps:$4 sm:$0xff] (!%p454_p10)   ;;  %v2357_v2 = vmov (!%p454_p10), 0.0   ;;  %v528_v28 = vlaneseq (!%p454_p10) }
  0x15   : > { %457 = sbr.rel (%p454_p10) target bundleno = 2689 (0xa81), region = 80  ;;  %2022 = vmatprep.subr.bf16.mxu1 (!%p454_p10), %v2357_v2  ;;  %v2358_v3 = vmov (!%p454_p10), 0   ;;  %618 = vmatprep.subr.bf16.mxu0 (!%p454_p10), %v2171_v0  ;;  %v2174_v4 = vld [vmem:[%s2879_s3 + $0x14] ss:$8 sps:$4 sm:$0xff] (!%p454_p10)   ;;  %v2176_v5 = vld [vmem:[%s2879_s3 + $0x10] ss:$8 sps:$4 sm:$0xff] (!%p454_p10)  }
  0x16   : > { %650 = vmatprep.mubr.bf16.mxu0 (!%p454_p10), %v2358_v3  ;;  %vm2359_vm0 = vmmov (!%p454_p10), 0   ;;  %619 = vmatpush1.bf16.msra.mxu0 (!%p454_p10), %v2173_v1  ;;  %s2907_s1 = sld [smem:[#allocation14_spill]] (!%p454_p10)  ;;  %v2178_v7 = vld [vmem:[%s2879_s3 + $0x24] ss:$8 sps:$4 sm:$0xff] (!%p454_p10)   ;;  %v2180_v9 = vld [vmem:[%s2879_s3 + $0x20] ss:$8 sps:$4 sm:$0xff] (!%p454_p10)  }
  0x17   : > { %2038 = vmatprep.mubr.msk.bf16.mxu1 (!%p454_p10), %vm2359_vm0, %v2357_v2  ;;  %620 = vmatprep.subr.bf16.mxu0 (!%p454_p10), %v2174_v4  ;;  %v2182_v10 = vld [vmem:[%s2879_s3 + $0x34] ss:$8 sps:$4 sm:$0xff] (!%p454_p10)   ;;  %v2184_v12 = vld [vmem:[%s2879_s3 + $0x30] ss:$8 sps:$4 sm:$0xff] (!%p454_p10)   ;;  %p500_p11 = scmp.lt.s32.totalorder (!%p454_p10), %s2347_s21, 1  ;;  %s2908_s0 = sld [smem:[#allocation13_spill]] (!%p454_p10) }
  0x18   : > { %v2186_v13 = vld [vmem:[%s2879_s3 + $0x44] ss:$8 sps:$4 sm:$0xff] (!%p454_p10)   ;;  %v2188_v15 = vld [vmem:[%s2879_s3 + $0x40] ss:$8 sps:$4 sm:$0xff] (!%p454_p10)   ;;  %v2190_v16 = vld [vmem:[%s2879_s3 + $0x54] ss:$8 sps:$4 sm:$0xff] (!%p454_p10)  }
  0x19   : > { %v2192_v18 = vld [vmem:[%s2879_s3 + $0x50] ss:$8 sps:$4 sm:$0xff] (!%p454_p10)   ;;  %v2194_v19 = vld [vmem:[%s2879_s3 + $0x64] ss:$8 sps:$4 sm:$0xff] (!%p454_p10)   ;;  %v2196_v21 = vld [vmem:[%s2879_s3 + $0x60] ss:$8 sps:$4 sm:$0xff] (!%p454_p10)  }
  0x1a   : > { %621 = vmatpush1.bf16.msra.mxu0 (!%p454_p10), %v2176_v5  ;;  %v2198_v22 = vld [vmem:[%s2879_s3 + $0x74] ss:$8 sps:$4 sm:$0xff] (!%p454_p10)   ;;  %v2200_v24 = vld [vmem:[%s2879_s3 + $0x70] ss:$8 sps:$4 sm:$0xff] (!%p454_p10)   ;;  %v2596_v29 = vshrl.u32 (!%p454_p10), %v528_v28, 7  ;;  %s2360_s20 = smov (!%p454_p10), 96  }
  0x1b   : > { %622 = vmatprep.subr.bf16.mxu0 (!%p454_p10), %v2178_v7  ;;  %v526_v31 = vld [vmem:[%s2880_s4] sm:$0x3] (!%p454_p10)  ;;  %vm783_vm1 = vcmask (!%p454_p10), 261120   ;;  %s2361_s16 = smov (!%p454_p10), 64   ;;  %vm846_vm2 = vcmask (!%p454_p10), 1043456   ;;  %vm831_vm3 = vcmask (!%p454_p10), 64512  }
  0x1c   : > { %v2177_v6 = vld [vmem:[%s2907_s1] sm:$0xff]   ;;  %v2181_v8 = vld [vmem:[%s2907_s1 + $0x8] sm:$0xff]   ;;  %v2185_v11 = vld [vmem:[%s2907_s1 + $0x10] sm:$0xff]   ;;  %s501_s25 = scalar_select %p500_p11, %s2347_s21, 1  ;;  %v530_v30 = vsub.s32 0, %v2596_v29  ;;  %v534_v32 = vsub.s32 1, %v2596_v29 }
  0x1d   : > { %2023 = vmatpush3.bf16.msra.mxu1 %v2177_v6  ;;  %v2189_v14 = vld [vmem:[%s2907_s1 + $0x18] sm:$0xff]   ;;  %v2193_v17 = vld [vmem:[%s2907_s1 + $0x20] sm:$0xff]   ;;  %v2197_v20 = vld [vmem:[%s2907_s1 + $0x28] sm:$0xff]   ;;  %vm893_vm4 = vcmask 257024   ;;  %vm1022_vm5 = vcmask 519424   ;;  %vm1150_vm6 = vcmask 781824  }
  0x1e   : > { %2024 = vmatprep.subr.bf16.mxu1 %v2357_v2  ;;  %623 = vmatpush1.bf16.msra.mxu0 %v2180_v9  ;;  %s1870_s22 = sshll.u32 %s501_s25, 2  ;;  %v2201_v23 = vld [vmem:[%s2907_s1 + $0x30] sm:$0xff]   ;;  %v2202_v25 = vld [vmem:[%s2907_s1 + $0x38] sm:$0xff]   ;;  %v531_v33 = vrot.slane %v526_v31, %v530_v30  ;;  %v535_v34 = vrot.slane %v526_v31, %v534_v32  ;;  %v1887_v36 = vld [vmem:[%s2878_s2] ss:$0 sm:$0xff]  ;;  %s2362_s25 = smov 32  }
  0x1f   : > { %624 = vmatprep.subr.bf16.mxu0 %v2182_v10  ;;  %s503_s27 = scalar_lea.vmem %s2908_s0, %s1870_s22  ;;  %vm1278_vm7 = vcmask 1044224   ;;  %s497_s15 = sand.u32 1, %s2339_s19  }
  0x20   : > { %v509_v26 = vld [vmem:[%s503_s27] sm:$0xf]  ;;  %s1869_s18 = sshll.u32 %s497_s15, 3  ;;  %s1960_s24 = sshll.u32 %s2347_s21, 7 }
  0x21   : > { %2025 = vmatpush3.bf16.msra.mxu1 %v2181_v8  ;;  %v2587_v27 = vld [vmem:[%s503_s27] sm:$0xf]  ;;  %s499_s27 = scalar_lea.vmem [#allocation5], %s1869_s18  ;;  %s2909_s0 = sld [smem:[#allocation15_spill]] }
  0x22   : > { %2026 = vmatprep.subr.bf16.mxu1 %v2357_v2  ;;  %625 = vmatpush1.bf16.msra.mxu0 %v2184_v12  ;;  %s1794_s26 = sshll.u32 %s499_s27, 4  ;;  %s1780_s17 = scalar_lea.sflag [#allocation6], %s497_s15  ;;  %s2831_s26 = int_to_ptr.vmem [resolvable:$true] %s1794_s26 }
  0x23   : > { %626 = vmatprep.subr.bf16.mxu0 %v2186_v13  ;;  %s2363_s21 = smov [#allocation5]  }
  0x24   : > { %s2281_s18 = sshll.u32 %s2363_s21, 4  ;;  %s2282_s18 = int_to_ptr.vmem [resolvable:$false] %s2281_s18 }
  0x25   : > { %2027 = vmatpush3.bf16.msra.mxu1 %v2185_v11  ;;  %p2284_p1 = scmp.lt.s32.totalorder %s2831_s26, %s2282_s18 }
  0x26   : > { %2028 = vmatprep.subr.bf16.mxu1 %v2357_v2  ;;  %627 = vmatpush1.bf16.msra.mxu0 %v2188_v15 }
  0x27   : > { %628 = vmatprep.subr.bf16.mxu0 %v2190_v16  ;;  %s2829_s1 = scalar_lea.hbm %s2909_s0, %s1960_s24 }
  0x29   : > { %2029 = vmatpush3.bf16.msra.mxu1 %v2189_v14 }
  0x2a   : > { %2030 = vmatprep.subr.bf16.mxu1 %v2357_v2  ;;  %629 = vmatpush1.bf16.msra.mxu0 %v2192_v18 }
  0x2b   : > { %630 = vmatprep.subr.bf16.mxu0 %v2194_v19 }
  0x2d   : > { %2031 = vmatpush3.bf16.msra.mxu1 %v2193_v17 }
  0x2e   : > { %2032 = vmatprep.subr.bf16.mxu1 %v2357_v2  ;;  %631 = vmatpush1.bf16.msra.mxu0 %v2196_v21 }
  0x2f   : > { %632 = vmatprep.subr.bf16.mxu0 %v2198_v22 }
  0x31   : > { %2033 = vmatpush3.bf16.msra.mxu1 %v2197_v20 }
  0x32   : > { %2034 = vmatprep.subr.bf16.mxu1 %v2357_v2  ;;  %633 = vmatpush1.bf16.msra.mxu0 %v2200_v24 }
  0x33   : > { %2066 = vmatprep.subr.bf16.mxu0 %v2357_v2 }
  0x35   : > { %2035 = vmatpush3.bf16.msra.mxu1 %v2201_v23  ;;  %651 = vmatmul.mubr.bf16.vlgmr.msra.gmra.mrb[0].mxu0 %v509_v26 }
  0x36   : > { %2036 = vmatprep.subr.bf16.mxu1 %v2357_v2  ;;  %2068 = vmatprep.mubr.msk.bf16.mxu0 %vm2359_vm0, %v2357_v2 }
  0x39   : > { %2037 = vmatpush3.bf16.msra.mxu1 %v2202_v25 }
  0x3a   : > { %2042 = vmatprep.subr.bf16.mxu1 %v2357_v2 }
  0x3c   : > { %2039 = vmatmul.mubr.bf16.vlgmr.msra.gmra.mrb[0].mxu1 %v2587_v27 }
  0x3d   : > { %2044 = vmatprep.mubr.msk.bf16.mxu1 %vm2359_vm0, %v2357_v2 }
 0x108   : > { %v652_v35 = vpop.f32.mrb[0].mxu0 }
 0x109   : > { %v653_v37 = vadd.f32 %v652_v35, %v531_v33  ;;  %v654_v38 = vpop.f32.mrb[1].mxu0 }
 0x10a   : > { %v655_v39 = vadd.f32 %v654_v38, %v535_v34  ;;  %v656_v40 = vpop.f32.mrb[2].mxu0 }
 0x10b   : > { %v659_v42 = vpack.c.bf16 %v653_v37, %v653_v37  ;;  %v657_v43 = vpop.f32.mrb[3].mxu0 }
 0x10c   : > { %v661_v46 = vpack.c.bf16 %v655_v39, %v655_v39 }
 0x10d   : > { %660 = vst [vmem:[#allocation2] sm:$0xf] %v659_v42 }
 0x10e   : > { %662 = vst [vmem:[#allocation3] sm:$0xf] %v661_v46 }
 0x10f   : > { %v775_v41 = vpop.f32.mrb[0].mxu1 }
 0x110   : > { %v776_v44 = vadd.f32 %v1887_v36, %v775_v41  ;;  %v2040_v45 = vpop.f32.mrb[1].mxu1 }
 0x111   : > { %v778_v47 = vpop.f32.mrb[2].mxu1 }
 0x112   : > { %v781_v48 = vpack.c.bf16 %v776_v44, %v776_v44  ;;  %v2041_v49 = vpop.f32.mrb[3].mxu1 }
 0x114   : > { %897 = vrot.lane.b32.xlu1 %v781_v48, %s2360_s20  ;;  %v782_v50 = vld [vmem:[#allocation2] sm:$0xf] }
 0x115   : > { %v2203_v51 = vld [vmem:[#allocation2] ss:$0 sps:$4 sm:$0xff]   ;;  %v788_v52 = vsel %vm783_vm1, %v782_v50, 0  ;;  %v842_v53 = vld [vmem:[#allocation3] sm:$0xf] }
 0x116   : > { %2043 = vmatpush3.bf16.xpose.msra.mxu1 %v788_v52  ;;  %v2204_v54 = vld [vmem:[#allocation2] ss:$0 sps:$4 sm:$0xff]   ;;  %v848_v55 = vsel %vm846_vm2, %v842_v53, 0  ;;  %v2206_v20 = vld [vmem:[#allocation3] ss:$0 sps:$4 sm:$0xff]  }
 0x117   : > { %2048 = vmatprep.subr.bf16.mxu1 %v2357_v2  ;;  %v2205_v7 = vld [vmem:[#allocation2] ss:$0 sps:$4 sm:$0xff]   ;;  %v2207_v45 = vld [vmem:[#allocation3] ss:$0 sps:$4 sm:$0xff]  }
 0x118   : > { %1030 = vrot.lane.b32.xlu1 %v2203_v51, %s2361_s16  ;;  %v2208_v46 = vld [vmem:[#allocation3] ss:$0 sps:$4 sm:$0xff]  }
 0x11c   : > { %1025 = vrot.lane.b32.xlu1 %v781_v48, %s2361_s16 }
 0x11d   : > { %2045 = vmatmul.mubr.msk.bf16.vlgmr.msra.gmra.mrb[4].mxu1 %vm783_vm1, %v781_v48 }
 0x11e   : > { %2049 = vmatpush3.bf16.msra.mxu1 %v848_v55  ;;  %2050 = vmatprep.mubr.msk.bf16.mxu1 %vm2359_vm0, %v2357_v2 }
 0x11f   : > { %2054 = vmatprep.subr.bf16.mxu1 %v2357_v2 }
 0x120   : > { %1158 = vrot.lane.b32.xlu1 %v2204_v54, %s2362_s25 }
 0x124   : > { %1153 = vrot.lane.b32.xlu1 %v781_v48, %s2362_s25 }
 0x186   : > { %v898_v56 = vpop.permute.xlu1 %897 }
 0x18a   : > { %v1031_v57 = vpop.permute.xlu1 %1030 }
 0x18b   : > { %v1036_v58 = vsel %vm783_vm1, %v1031_v57, 0 }
 0x18c   : > { %2067 = vmatpush3.bf16.xpose.msra.mxu0 %v1036_v58 }
 0x18d   : > { %2078 = vmatprep.subr.bf16.mxu0 %v2357_v2 }
 0x18e   : > { %v1026_v59 = vpop.permute.xlu1 %1025 }
 0x192   : > { %v1159_v60 = vpop.permute.xlu1 %1158 }
 0x193   : > { %v1164_v61 = vsel %vm783_vm1, %v1159_v60, 0  ;;  %2069 = vmatmul.mubr.msk.bf16.vlgmr.msra.gmra.mrb[4].mxu0 %vm783_vm1, %v1026_v59 }
 0x194   : > { %2079 = vmatpush3.bf16.xpose.msra.mxu0 %v1164_v61  ;;  %2080 = vmatprep.mubr.msk.bf16.mxu0 %vm2359_vm0, %v2357_v2 }
 0x195   : > { %2090 = vmatprep.subr.bf16.mxu0 %v2357_v2 }
 0x196   : > { %v1154_v62 = vpop.permute.xlu1 %1153 }
 0x19b   : > { %2081 = vmatmul.mubr.msk.bf16.vlgmr.msra.gmra.mrb[8].mxu0 %vm783_vm1, %v1154_v62 }
 0x19c   : > { %2106 = vmatprep.mubr.msk.bf16.mxu0 %vm2359_vm0, %v2357_v2 }
 0x1f0   : > { %v824_v63 = vpop.f32.mrb[4].mxu1 }
 0x1f1   : > { %v830_v0 = vmul.f32 0.17677669, %v824_v63  ;;  %v2046_v1 = vpop.f32.mrb[5].mxu1 }
 0x1f2   : > { %v827_v4 = vpop.f32.mrb[6].mxu1 }
 0x1f3   : > { %v2047_v5 = vpop.f32.mrb[7].mxu1  ;;  %v832_v6 = vsel %vm831_vm3, %v830_v0, -inf }
 0x1f4   : > { %833 = vmax.xlane.f32.xlu0 %v832_v6 }
 0x20a   : > { %902 = vrot.lane.b32.xlu0 %v2205_v7, %s2360_s20  ;;  %v2209_v7 = vld [vmem:[%s2881_s5] sm:$0xff]  }
 0x20b   : > { %2091 = vmatpush3.bf16.msra.mxu0 %v2209_v7  ;;  %v2229_v7 = vld [vmem:[%s2885_s9 + $0x40] ss:$8 sps:$4 sm:$0xff]  }
 0x20c   : > { %2092 = vmatprep.subr.bf16.mxu0 %v2357_v2 }
 0x266   : > { %v1072_v8 = vpop.f32.mrb[4].mxu0 }
 0x267   : > { %v1078_v9 = vmul.f32 0.17677669, %v1072_v8  ;;  %v2070_v10 = vpop.f32.mrb[5].mxu0  ;;  %v2210_v8 = vld [vmem:[%s2881_s5 + $0x8] sm:$0xff]  }
 0x268   : > { %v1075_v11 = vpop.f32.mrb[6].mxu0  ;;  %2093 = vmatpush3.bf16.msra.mxu0 %v2210_v8  ;;  %v2234_v8 = vld [vmem:[%s2885_s9 + $0x54] ss:$8 sps:$4 sm:$0xff]  }
 0x269   : > { %v2071_v12 = vpop.f32.mrb[7].mxu0  ;;  %v1079_v13 = vsel %vm831_vm3, %v1078_v9, -inf  ;;  %2094 = vmatprep.subr.bf16.mxu0 %v2357_v2 }
 0x26a   : > { %1080 = vmax.xlane.f32.xlu0 %v1079_v13 }
 0x26e   : > { %v1200_v14 = vpop.f32.mrb[8].mxu0 }
 0x26f   : > { %v1206_v15 = vmul.f32 0.17677669, %v1200_v14  ;;  %v2082_v16 = vpop.f32.mrb[9].mxu0  ;;  %v2211_v14 = vld [vmem:[%s2881_s5 + $0x10] sm:$0xff]  }
 0x270   : > { %v1203_v17 = vpop.f32.mrb[10].mxu0  ;;  %2095 = vmatpush3.bf16.msra.mxu0 %v2211_v14  ;;  %v2242_v14 = vld [vmem:[%s2887_s11] sm:$0xff]  }
 0x271   : > { %v2083_v18 = vpop.f32.mrb[11].mxu0  ;;  %v1207_v19 = vsel %vm831_vm3, %v1206_v15, -inf  ;;  %2096 = vmatprep.subr.bf16.mxu0 %v2357_v2 }
 0x272   : > { %1208 = vmax.xlane.f32.xlu1 %v1207_v19  ;;  %v2213_v19 = vld [vmem:[%s2881_s5 + $0x20] sm:$0xff]  }
 0x280   : > { %965 = vrot.lane.b32.xlu0 %v2206_v20, %s2360_s20 }
 0x281   : > { %v834_v21 = vpop.xlane.xlu0 %833 }
 0x282   : > { %v835_v22 = vsub.f32 %v830_v0, %v834_v21 }
 0x284   : > { %v836_v23 = vmul.f32 1.442695, %v835_v22 }
 0x285   : > { %v903_v25 = vpop.permute.xlu0 %902 }
 0x286   : > { %2257 = vpow2.f32 %v836_v23  ;;  %v908_v28 = vsel %vm783_vm1, %v903_v25, 0  ;;  %v2214_v23 = vld [vmem:[%s2881_s5 + $0x28] sm:$0xff]  }
 0x290   : > { %v2258_v24 = vpop.eup %2257 }
 0x291   : > { %v841_v26 = vpack.c.bf16 %v2258_v24, %v2258_v24  ;;  %v838_v1 = vsel %vm831_vm3, %v2258_v24, 0.0 }
 0x293   : > { %2051 = vmatmul.mubr.msk.bf16.vlgmr.msra.gmra.mrb[8].mxu1 %vm831_vm3, %v841_v26 }
 0x294   : > { %2055 = vmatpush3.bf16.xpose.msra.mxu1 %v908_v28  ;;  %2056 = vmatprep.mubr.msk.bf16.mxu1 %vm2359_vm0, %v2357_v2 }
 0x295   : > { %2060 = vmatprep.subr.bf16.mxu1 %v2357_v2 }
 0x29b   : > { %2057 = vmatmul.mubr.msk.bf16.vlgmr.msra.gmra.mrb[12].mxu1 %vm783_vm1, %v898_v56 }
 0x29c   : > { %2062 = vmatprep.mubr.msk.bf16.mxu1 %vm2359_vm0, %v2357_v2 }
 0x2f7   : > { %v1081_v31 = vpop.xlane.xlu0 %1080 }
 0x2f8   : > { %v1082_v47 = vsub.f32 %v1078_v9, %v1081_v31  ;;  %v2215_v31 = vld [vmem:[%s2881_s5 + $0x30] sm:$0xff]  }
 0x2fa   : > { %v1083_v48 = vmul.f32 1.442695, %v1082_v47 }
 0x2fb   : > { %v966_v33 = vpop.permute.xlu0 %965 }
 0x2fc   : > { %v971_v34 = vsel %vm846_vm2, %v966_v33, 0  ;;  %2259 = vpow2.f32 %v1083_v48 }
 0x2fd   : > { %2061 = vmatpush3.bf16.msra.mxu1 %v971_v34 }
 0x2fe   : > { %2072 = vmatprep.subr.bf16.mxu1 %v2357_v2 }
 0x2ff   : > { %v1209_v51 = vpop.xlane.xlu1 %1208 }
 0x300   : > { %v1210_v52 = vsub.f32 %v1206_v15, %v1209_v51  ;;  %v2212_v15 = vld [vmem:[%s2881_s5 + $0x18] sm:$0xff]  }
 0x301   : > { %2097 = vmatpush3.bf16.msra.mxu0 %v2212_v15  ;;  %v2243_v15 = vld [vmem:[%s2887_s11 + $0x48] sm:$0xff]  }
 0x302   : > { %v1211_v55 = vmul.f32 1.442695, %v1210_v52  ;;  %2098 = vmatprep.subr.bf16.mxu0 %v2357_v2 }
 0x305   : > { %2099 = vmatpush3.bf16.msra.mxu0 %v2213_v19  ;;  %v2247_v19 = vld [vmem:[%s2887_s11 + $0x58] sm:$0xff]  }
 0x306   : > { %v2260_v49 = vpop.eup %2259  ;;  %2100 = vmatprep.subr.bf16.mxu0 %v2357_v2 }
 0x307   : > { %v1085_v50 = vsel %vm831_vm3, %v2260_v49, 0.0  ;;  %v1088_v4 = vpack.c.bf16 %v2260_v49, %v2260_v49  ;;  %v1913_v49 = vld [vmem:[%s2882_s6] ss:$0 sm:$0xff] }
 0x309   : > { %2101 = vmatpush3.bf16.msra.mxu0 %v2214_v23  ;;  %v2251_v23 = vld [vmem:[%s2887_s11 + $0x68] sm:$0xff]  }
 0x30a   : > { %2102 = vmatprep.subr.bf16.mxu0 %v2357_v2 }
 0x30d   : > { %2103 = vmatpush3.bf16.msra.mxu0 %v2215_v31 }
 0x30e   : > { %2104 = vmatprep.subr.bf16.mxu0 %v2357_v2 }
 0x366   : > { %v2647_v35 = vpop.f32.mrb[8].mxu1 }
 0x367   : > { %v2052_v36 = vpop.f32.mrb[9].mxu1 }
 0x368   : > { %v887_v37 = vpop.f32.mrb[10].mxu1  ;;  %v2216_v36 = vld [vmem:[%s2881_s5 + $0x38] sm:$0xff]  }
 0x369   : > { %v2053_v38 = vpop.f32.mrb[11].mxu1  ;;  %2105 = vmatpush3.bf16.msra.mxu0 %v2216_v36 }
 0x36e   : > { %v944_v39 = vpop.f32.mrb[12].mxu1 }
 0x36f   : > { %v950_v40 = vmul.f32 0.17677669, %v944_v39  ;;  %v2058_v41 = vpop.f32.mrb[13].mxu1 }
 0x370   : > { %v947_v42 = vpop.f32.mrb[14].mxu1 }
 0x371   : > { %v2059_v43 = vpop.f32.mrb[15].mxu1  ;;  %v951_v44 = vsel %vm831_vm3, %v950_v40, -inf }
 0x372   : > { %952 = vmax.xlane.f32.xlu1 %v951_v44 }
 0x383   : > { %1093 = vrot.lane.b32.xlu1 %v2207_v45, %s2361_s16 }
 0x387   : > { %1221 = vrot.lane.b32.xlu1 %v2208_v46, %s2362_s25 }
 0x3ab   : > { %1086 = vadd.xlane.f32.xlu1 %v1085_v50  ;;  %v669_v50 = vunpack.c.l.bf16 %v2587_v27  ;;  %v2220_v27 = vld [vmem:[%s2885_s9 + $0x10] ss:$8 sps:$4 sm:$0xff]  }
 0x3ff   : > { %v953_v53 = vpop.xlane.xlu1 %952 }
 0x400   : > { %v954_v54 = vsub.f32 %v950_v40, %v953_v53 }
 0x402   : > { %v955_v56 = vmul.f32 1.442695, %v954_v54 }
 0x403   : > { %v1094_v58 = vpop.permute.xlu1 %1093 }
 0x404   : > { %2261 = vpow2.f32 %v955_v56  ;;  %v1099_v62 = vsel %vm846_vm2, %v1094_v58, 0  ;;  %v2219_v58 = vld [vmem:[%s2885_s9 + $0x4] ss:$8 sps:$4 sm:$0xff]  }
 0x405   : > { %2263 = vpow2.f32 %v1211_v55 }
 0x407   : > { %v1222_v0 = vpop.permute.xlu1 %1221 }
 0x408   : > { %v1227_v5 = vsel %vm846_vm2, %v1222_v0, 0 }
 0x40e   : > { %v2262_v57 = vpop.eup %2261 }
 0x40f   : > { %v957_v59 = vsel %vm831_vm3, %v2262_v57, 0.0  ;;  %v960_v60 = vpack.c.bf16 %v2262_v57, %v2262_v57  ;;  %v2264_v61 = vpop.eup %2263  ;;  %v2217_v57 = vld [vmem:[%s2885_s9] ss:$8 sps:$4 sm:$0xff]  }
 0x410   : > { %958 = vadd.xlane.f32.xlu0 %v957_v59  ;;  %v1213_v63 = vsel %vm831_vm3, %v2264_v61, 0.0  ;;  %v1216_v6 = vpack.c.bf16 %v2264_v61, %v2264_v61  ;;  %v2222_v59 = vld [vmem:[%s2885_s9 + $0x14] ss:$8 sps:$4 sm:$0xff]   ;;  %v2223_v61 = vld [vmem:[%s2885_s9 + $0x20] ss:$8 sps:$4 sm:$0xff]  }
 0x411   : > { %2063 = vmatmul.mubr.msk.bf16.vlgmr.msra.gmra.mrb[16].mxu1 %vm831_vm3, %v960_v60  ;;  %v2225_v60 = vld [vmem:[%s2885_s9 + $0x24] ss:$8 sps:$4 sm:$0xff]  }
 0x412   : > { %2073 = vmatpush3.bf16.msra.mxu1 %v1099_v62  ;;  %2074 = vmatprep.mubr.msk.bf16.mxu1 %vm2359_vm0, %v2357_v2 }
 0x413   : > { %2084 = vmatprep.subr.bf16.mxu1 %v2357_v2 }
 0x414   : > { %1214 = vadd.xlane.f32.xlu0 %v1213_v63 }
 0x418   : > { %839 = vadd.xlane.f32.xlu0 %v838_v1 }
 0x419   : > { %2075 = vmatmul.mubr.msk.bf16.vlgmr.msra.gmra.mrb[20].mxu1 %vm831_vm3, %v1088_v4  ;;  %v2228_v4 = vld [vmem:[%s2885_s9 + $0x34] ss:$8 sps:$4 sm:$0xff]  }
 0x41a   : > { %2085 = vmatpush3.bf16.msra.mxu1 %v1227_v5  ;;  %2086 = vmatprep.mubr.msk.bf16.mxu1 %vm2359_vm0, %v2357_v2  ;;  %v2226_v5 = vld [vmem:[%s2885_s9 + $0x30] ss:$8 sps:$4 sm:$0xff]  }
 0x41b   : > { %1530 = vmatprep.subr.bf16.mxu1 %v2219_v58 }
 0x421   : > { %2087 = vmatmul.mubr.msk.bf16.vlgmr.msra.gmra.mrb[24].mxu1 %vm831_vm3, %v1216_v6  ;;  %v2231_v6 = vld [vmem:[%s2885_s9 + $0x44] ss:$8 sps:$4 sm:$0xff]  }
 0x422   : > { %1562 = vmatprep.mubr.bf16.mxu1 %v2358_v3  ;;  %1531 = vmatpush1.bf16.msra.mxu1 %v2217_v57 }
 0x423   : > { %1532 = vmatprep.subr.bf16.mxu1 %v2222_v59 }
 0x426   : > { %1533 = vmatpush1.bf16.msra.mxu1 %v2220_v27 }
 0x427   : > { %1534 = vmatprep.subr.bf16.mxu1 %v2225_v60 }
 0x42a   : > { %1535 = vmatpush1.bf16.msra.mxu1 %v2223_v61 }
 0x42b   : > { %1536 = vmatprep.subr.bf16.mxu1 %v2228_v4 }
 0x42e   : > { %1537 = vmatpush1.bf16.msra.mxu1 %v2226_v5  ;;  %v1957_v5 = vld [vmem:[%s2889_s13] ss:$0 sm:$0xff] }
 0x42f   : > { %1538 = vmatprep.subr.bf16.mxu1 %v2231_v6 }
 0x432   : > { %1539 = vmatpush1.bf16.msra.mxu1 %v2229_v7  ;;  %v1958_v7 = vld [vmem:[%s2890_s14] ss:$0 sm:$0xff] }
 0x433   : > { %1540 = vmatprep.subr.bf16.mxu1 %v2234_v8 }
 0x438   : > { %v1087_v16 = vpop.xlane.xlu1 %1086 }
 0x49d   : > { %v959_v9 = vpop.xlane.xlu0 %958 }
 0x4a1   : > { %v1215_v10 = vpop.xlane.xlu0 %1214 }
 0x4a5   : > { %v840_v11 = vpop.xlane.xlu0 %839 }
 0x4a6   : > { %2265 = vrcp.f32 %v840_v11  ;;  %v2235_v11 = vld [vmem:[%s2885_s9 + $0x60] ss:$8 sps:$4 sm:$0xff]  }
 0x4a7   : > { %2267 = vrcp.f32 %v959_v9  ;;  %v2232_v9 = vld [vmem:[%s2885_s9 + $0x50] ss:$8 sps:$4 sm:$0xff]  }
 0x4a8   : > { %2269 = vrcp.f32 %v1087_v16  ;;  %1541 = vmatpush1.bf16.msra.mxu1 %v2232_v9  ;;  %v2244_v16 = vld [vmem:[%s2887_s11 + $0x8] sm:$0xff]  }
 0x4a9   : > { %2271 = vrcp.f32 %v1215_v10  ;;  %v2237_v10 = vld [vmem:[%s2885_s9 + $0x64] ss:$8 sps:$4 sm:$0xff]  }
 0x4aa   : > { %1542 = vmatprep.subr.bf16.mxu1 %v2237_v10 }
 0x4ac   : > { %1543 = vmatpush1.bf16.msra.mxu1 %v2235_v11 }
 0x4b0   : > { %v2266_v12 = vpop.eup %2265 }
 0x4b1   : > { %v891_v3 = vmul.f32 %v2266_v12, %v2647_v35  ;;  %v2268_v17 = vpop.eup %2267  ;;  %v2240_v12 = vld [vmem:[%s2885_s9 + $0x74] ss:$8 sps:$4 sm:$0xff]  }
 0x4b2   : > { %v2270_v26 = vpop.eup %2269  ;;  %1544 = vmatprep.subr.bf16.mxu1 %v2240_v12 }
 0x4b3   : > { %v892_v13 = vpack.c.bf16 %v891_v3, %v891_v3  ;;  %v2272_v39 = vpop.eup %2271  ;;  %v2238_v3 = vld [vmem:[%s2885_s9 + $0x70] ss:$8 sps:$4 sm:$0xff]  }
 0x4b4   : > { %1545 = vmatpush1.bf16.msra.mxu1 %v2238_v3 }
 0x4b5   : > { %894 = vst.msk [vmem:[#allocation4] sm:$0xf] %vm893_vm4, %v892_v13  ;;  %v2241_v13 = vld [vmem:[%s2887_s11 + $0x40] sm:$0xff]  }
 0x4b6   : > { %2000 = vmatprep.subr.bf16.mxu0 %v2241_v13 }
 0x4e4   : > { %v1007_v18 = vpop.f32.mrb[16].mxu1 }
 0x4e5   : > { %v1014_v20 = vmul.f32 %v2268_v17, %v1007_v18  ;;  %v2064_v21 = vpop.f32.mrb[17].mxu1  ;;  %v2245_v17 = vld [vmem:[%s2887_s11 + $0x50] sm:$0xff]  }
 0x4e6   : > { %v1010_v22 = vpop.f32.mrb[18].mxu1  ;;  %v2246_v18 = vld [vmem:[%s2887_s11 + $0x10] sm:$0xff]   ;;  %v2249_v21 = vld [vmem:[%s2887_s11 + $0x60] sm:$0xff]  }
 0x4e7   : > { %v1963_v24 = vpack.c.bf16 %v1014_v20, %v1014_v20  ;;  %v2065_v25 = vpop.f32.mrb[19].mxu1  ;;  %v2248_v20 = vld [vmem:[%s2887_s11 + $0x18] sm:$0xff]   ;;  %v2250_v22 = vld [vmem:[%s2887_s11 + $0x20] sm:$0xff]  }
 0x4e9   : > { %1019 = vrot.lane.b32.xlu1 %v1963_v24, %s2362_s25  ;;  %v2252_v24 = vld [vmem:[%s2887_s11 + $0x28] sm:$0xff]   ;;  %s2283_s25 = scalar_lea.vmem %s2282_s18, 256 }
 0x4ec   : > { %v1135_v28 = vpop.f32.mrb[20].mxu1 }
 0x4ed   : > { %v1142_v33 = vmul.f32 %v2270_v26, %v1135_v28  ;;  %v2076_v34 = vpop.f32.mrb[21].mxu1 }
 0x4ee   : > { %v1138_v35 = vpop.f32.mrb[22].mxu1 }
 0x4ef   : > { %v1964_v37 = vpack.c.bf16 %v1142_v33, %v1142_v33  ;;  %v2077_v38 = vpop.f32.mrb[23].mxu1  ;;  %v1922_v33 = vld [vmem:[%s2883_s7] ss:$0 sm:$0xff] }
 0x4f0   : > { %v1923_v35 = vld [vmem:[%s2884_s8] ss:$0 sm:$0xff] }
 0x4f1   : > { %1147 = vrot.lane.b32.xlu0 %v1964_v37, %s2361_s16  ;;  %s2277_s16 = scalar_lea.vmem %s2831_s26, 128 }
 0x4f2   : > { %p2278_p12 = scmp.ne.s32.totalorder %s2831_s26, %s2277_s16  ;;  %p2285_p2 = scmp.lt.s32.totalorder %s2283_s25, %s2277_s16 }
 0x4f4   : > { %v1263_v40 = vpop.f32.mrb[24].mxu1  ;;  %p2279_p13 = pnand %p2278_p12, %p2484_p4  ;;  %p2286_p3 = por %p2285_p2, %p2284_p1 }
 0x4f5   : > { %v1270_v41 = vmul.f32 %v2272_v39, %v1263_v40  ;;  %v2088_v42 = vpop.f32.mrb[25].mxu1  ;;  %v2253_v39 = vld [vmem:[%s2887_s11 + $0x70] sm:$0xff]  }
 0x4f6   : > { %v1266_v43 = vpop.f32.mrb[26].mxu1  ;;  %v2254_v40 = vld [vmem:[%s2887_s11 + $0x30] sm:$0xff]   ;;  %v2256_v42 = vld [vmem:[%s2887_s11 + $0x38] sm:$0xff]   ;;  %p2280_p0 = pneg %p2279_p13 }
 0x4f7   : > { %v1965_v44 = vpack.c.bf16 %v1270_v41, %v1270_v41  ;;  %v2089_v45 = vpop.f32.mrb[27].mxu1  ;;  %v2255_v41 = vld [vmem:[%s2887_s11 + $0x78] sm:$0xff]   ;;  %v1438_v43 = vld [vmem:[%s2886_s10] sm:$0x3] }
 0x4f8   : > { %v1447_v45 = vrot.slane %v1438_v43, %v534_v32  ;;  %p2287_p5 = pnand %p2286_p3, %p2280_p0 }
 0x4f9   : > { %1275 = vrot.lane.b32.xlu1 %v1965_v44, %s2360_s20  ;;  %v1443_v44 = vrot.slane %v1438_v43, %v530_v30  ;;  %v1940_v30 = vld [vmem:[%s2888_s12] ss:$0 sm:$0xff] }
 0x55b   : > { %v1020_v46 = vpop.permute.xlu1 %1019 }
 0x55c   : > { %1023 = vst.msk [vmem:[#allocation4] sm:$0xf] %vm1022_vm5, %v1020_v46 }
 0x563   : > { %v1148_v47 = vpop.permute.xlu0 %1147 }
 0x564   : > { %1151 = vst.msk [vmem:[#allocation4] sm:$0xf] %vm1150_vm6, %v1148_v47 }
 0x56b   : > { %v1276_v2 = vpop.permute.xlu1 %1275 }
 0x56c   : > { %1279 = vst.msk [vmem:[#allocation4] sm:$0xf] %vm1278_vm7, %v1276_v2 }
 0x573   : > { %v1280_v48 = vld [vmem:[#allocation4] sm:$0xf] }
 0x574   : > { %2107 = vmatmul.mubr.bf16.vlgmr.msra.gmra.mrb[12].mxu0 %v1280_v48 }
 0x575   : > { %2001 = vmatpush3.bf16.msra.mxu0 %v2242_v14 }
 0x576   : > { %2002 = vmatprep.subr.bf16.mxu0 %v2243_v15 }
 0x579   : > { %2003 = vmatpush3.bf16.msra.mxu0 %v2244_v16 }
 0x57a   : > { %2004 = vmatprep.subr.bf16.mxu0 %v2245_v17 }
 0x57d   : > { %2005 = vmatpush3.bf16.msra.mxu0 %v2246_v18 }
 0x57e   : > { %2006 = vmatprep.subr.bf16.mxu0 %v2247_v19 }
 0x581   : > { %2007 = vmatpush3.bf16.msra.mxu0 %v2248_v20 }
 0x582   : > { %2008 = vmatprep.subr.bf16.mxu0 %v2249_v21 }
 0x585   : > { %2009 = vmatpush3.bf16.msra.mxu0 %v2250_v22 }
 0x586   : > { %2010 = vmatprep.subr.bf16.mxu0 %v2251_v23 }
 0x589   : > { %2011 = vmatpush3.bf16.msra.mxu0 %v2252_v24 }
 0x58a   : > { %2012 = vmatprep.subr.bf16.mxu0 %v2253_v39 }
 0x58d   : > { %2013 = vmatpush3.bf16.msra.mxu0 %v2254_v40 }
 0x58e   : > { %2014 = vmatprep.subr.bf16.mxu0 %v2255_v41 }
 0x591   : > { %2015 = vmatpush3.bf16.msra.mxu0 %v2256_v42 }
 0x647   : > { %v1386_v51 = vpop.f32.mrb[12].mxu0 }
 0x648   : > { %v1387_v52 = vadd.f32 %v1913_v49, %v1386_v51  ;;  %v2108_v53 = vpop.f32.mrb[13].mxu0 }
 0x649   : > { %v1389_v54 = vpop.f32.mrb[14].mxu0 }
 0x64a   : > { %v2109_v55 = vpop.f32.mrb[15].mxu0  ;;  %v1392_v56 = vadd.f32 %v1387_v52, %v669_v50 }
 0x64c   : > { %1393 = vadd.xlane.f32.xlu1 %v1392_v56 }
 0x6d9   : > { %v1394_v62 = vpop.xlane.xlu1 %1393 }
 0x6da   : > { %v1396_v63 = vmul.f32 0.0078125, %v1394_v62 }
 0x6dc   : > { %v1397_v0 = vsub.f32 %v1392_v56, %v1396_v63 }
 0x6de   : > { %v1398_v1 = vmul.f32 %v1397_v0, %v1397_v0 }
 0x6e0   : > { %1399 = vadd.xlane.f32.xlu0 %v1398_v1 }
 0x76d   : > { %v1400_v25 = vpop.xlane.xlu0 %1399 }
 0x76e   : > { %v1401_v26 = vmul.f32 0.0078125, %v1400_v25 }
 0x770   : > { %v1402_v28 = vadd.f32 1e-05, %v1401_v26 }
 0x772   : > { %2273 = vrsqrt.f32 %v1402_v28 }
 0x77c   : > { %v2274_v31 = vpop.eup %2273 }
 0x77d   : > { %v1404_v34 = vmul.f32 %v2274_v31, %v1397_v0 }
 0x77f   : > { %v1412_v36 = vmul.f32 %v1922_v33, %v1404_v34 }
 0x781   : > { %v1420_v37 = vadd.f32 %v1923_v35, %v1412_v36 }
 0x783   : > { %v1421_v38 = vpack.c.bf16 %v1420_v37, %v1420_v37 }
 0x785   : > { %1563 = vmatmul.mubr.bf16.vlgmr.msra.gmra.mrb[28].mxu1 %v1421_v38 }
 0x858   : > { %v1564_v46 = vpop.f32.mrb[28].mxu1 }
 0x859   : > { %v1565_v47 = vadd.f32 %v1564_v46, %v1443_v44  ;;  %v1566_v2 = vpop.f32.mrb[29].mxu1 }
 0x85a   : > { %v1567_v48 = vadd.f32 %v1566_v2, %v1447_v45  ;;  %v1568_v49 = vpop.f32.mrb[30].mxu1 }
 0x85b   : > { %v1571_v50 = vmax.f32 %v1565_v47, 0.0  ;;  %v1569_v51 = vpop.f32.mrb[31].mxu1 }
 0x85c   : > { %v1572_v52 = vmax.f32 %v1567_v48, 0.0 }
 0x85d   : > { %v1573_v54 = vpack.c.bf16 %v1571_v50, %v1571_v50 }
 0x85e   : > { %v1574_v53 = vpack.c.bf16 %v1572_v52, %v1572_v52 }
 0x860   : > { %1742 = vmatprep.mubr.bf16.mxu0 %v1574_v53 }
 0x861   : > { %1743 = vmatmul.mubr.bf16.vlgmr.msra.gmra.mrb[16].mxu0 %v1573_v54 }
 0x934   : > { %v2016_v55 = vpop.f32.mrb[16].mxu0 }
 0x935   : > { %v2017_v56 = vpop.f32.mrb[17].mxu0 }
 0x936   : > { %v2018_v29 = vadd.f32 %v2017_v56, %v2016_v55  ;;  %v2019_v32 = vpop.f32.mrb[18].mxu0 }
 0x937   : > { %v2020_v57 = vpop.f32.mrb[19].mxu0 }
 0x938   : > { %v1745_v58 = vadd.f32 %v2018_v29, %v1940_v30 }
 0x93a   : > { %v1750_v59 = vadd.f32 %v1745_v58, %v1420_v37 }
 0x93c   : > { %1751 = vadd.xlane.f32.xlu0 %v1750_v59 }
 0x9c9   : > { %v1752_v27 = vpop.xlane.xlu0 %1751 }
 0x9ca   : > { %v1753_v60 = vmul.f32 0.0078125, %v1752_v27 }
 0x9cc   : > { %v1754_v61 = vsub.f32 %v1750_v59, %v1753_v60 }
 0x9ce   : > { %v1755_v62 = vmul.f32 %v1754_v61, %v1754_v61 }
 0x9d0   : > { %1756 = vadd.xlane.f32.xlu1 %v1755_v62 }
 0xa5d   : > { %v1757_v63 = vpop.xlane.xlu1 %1756 }
 0xa5e   : > { %v1758_v0 = vmul.f32 0.0078125, %v1757_v63 }
 0xa60   : > { %v1759_v1 = vadd.f32 1e-05, %v1758_v0 }
 0xa62   : > { %2275 = vrsqrt.f32 %v1759_v1 }
 0xa6c   : > { %v2276_v4 = vpop.eup %2275 }
 0xa6d   : > { %v1761_v6 = vmul.f32 %v2276_v4, %v1754_v61 }
 0xa6f   : > { %v1769_v8 = vmul.f32 %v1957_v5, %v1761_v6 }
 0xa71   : > { %v1777_v9 = vadd.f32 %v1958_v7, %v1769_v8 }
 0xa73   : > { %1778 = vst [vmem:[%s499_s27] sm:$0xff] %v1777_v9 }
 0xa74   : > { %2290 = shalt.err (!%p2287_p5)
}
 0xa75   : > { %s2291_s15 = scalar_lea.hbm %s2829_s1, 128  ;;  %s2295_s27 = scalar_lea.hbm %s2909_s0, 256 }
 0xa76   : > { %p2292_p6 = scmp.ne.s32.totalorder %s2829_s1, %s2291_s15  ;;  %p2296_p10 = scmp.lt.u32.totalorder %s2829_s1, %s2909_s0 }
 0xa77   : > { %p2297_p11 = scmp.lt.u32.totalorder %s2295_s27, %s2291_s15  ;;  %p2299_p13 = scmp.lt.u32.totalorder %s2291_s15, %s2829_s1 }
 0xa78   : > { %p2293_p7 = pnand %p2292_p6, %p2484_p4 }
 0xa79   : > { %p2298_p12 = por %p2297_p11, %p2296_p10 }
 0xa7a   : > { %p2294_p9 = pneg %p2293_p7 }
 0xa7b   : > { %p2300_p0 = por %p2299_p13, %p2298_p12 }
 0xa7d   : > { %p2301_p1 = pnand %p2300_p0, %p2294_p9 }
 0xa7f   : > { %2304 = shalt.err (!%p2301_p1)
}
 0xa80   : > { %2110 = dma.vmem_to_hbm [thread:$0]  (%p2484_p4), %s2831_s26, 128, %s2829_s1, %s1780_s17  }
 0xa81 PF: > { %s2910_s16 = sld [smem:[#allocation8_spill]]  ;;  %p2116_p2 = scmp.ge.s32.totalorder %s2355_s23, 2 }
 0xa83   : > { %p2113_p3 = pnand %p2116_p2, %p2491_p8 }
 0xa87   : > { %s1806_s21 = sand.u32 1, %s2910_s16  }
 0xa88   : > { %s1807_s18 = scalar_lea.sflag [#allocation6], %s1806_s21 }
 0xa89   : > { %2330 = dma.done.wait (!%p2113_p3), %s1807_s18, 128  }
 0xa8a   : > { %2332 = vsyncadd (!%p2113_p3), %s1807_s18, 4294967168  ;;  %s28_s23 = sadd.s32 1, %s2355_s23   ;;  %s2911_s25 = sld [smem:[#allocation9_spill]] }
 0xa8b   : > { %p25_p5 = scmp.ge.s32.totalorder %s28_s23, 4   ;;  %s2912_s20 = sld [smem:[#allocation12_spill]] }
 0xa8c   : > { %s2913_s21 = sld [smem:[#allocation10_spill]]  ;;  %s2914_s22 = sld [smem:[#allocation11_spill]] }
 0xa8d   : > { %s2915_s18 = smov %s2339_s19  ;;  %27 = sbr.rel (!%p25_p5) target bundleno = 8 (0x8), region = 120 }
 0xa90   : > { %s2916_s19 = smov %s2911_s25 }
 0xa94   :  { %1812 = vsyncpa [#allocation6], 1 }
 0xa95   :  { %1814 = vsyncpa [#allocation6 + $0x1], 1 }

// kernel: encoder_forward.2
= control target key start
LH: loop header
LB: loop body
LE: loop exit
PB: predicated region body
PF: predicated region fallthrough
CT: control target
= control target key end

     0   :  { %s2386_s21 = smov 0   ;;  %s2388_s22 = smov 0   ;;  %s2751_s0 = inlined_call_operand.vmem [shape: f32[2,8,128], index: 0, kind: input, shape index: {}]   ;;  %s2752_s1 = inlined_call_operand.vmem [shape: f32[8,128], index: 1, kind: input, shape index: {}]   ;;  %s2753_s2 = inlined_call_operand.vmem [shape: bf16[128,128], index: 2, kind: input, shape index: {}]   ;;  %s2754_s3 = inlined_call_operand.vmem [shape: f32[1,128], index: 3, kind: input, shape index: {}]   ;;  %s2755_s4 = inlined_call_operand.vmem [shape: bf16[128,256], index: 4, kind: input, shape index: {}]   ;;  %s2756_s5 = inlined_call_operand.vmem [shape: f32[1,256], index: 5, kind: input, shape index: {}]   ;;  %s2757_s6 = inlined_call_operand.vmem [shape: bf16[128,128], index: 6, kind: input, shape index: {}]   ;;  %s2758_s7 = inlined_call_operand.vmem [shape: f32[1,128], index: 7, kind: input, shape index: {}]   ;;  %s2759_s8 = inlined_call_operand.vmem [shape: f32[1,128], index: 8, kind: input, shape index: {}]   ;;  %s2760_s9 = inlined_call_operand.vmem [shape: f32[1,128], index: 9, kind: input, shape index: {}]   ;;  %s2761_s10 = inlined_call_operand.vmem [shape: bf16[128,256], index: 10, kind: input, shape index: {}]   ;;  %s2762_s11 = inlined_call_operand.vmem [shape: f32[1,256], index: 11, kind: input, shape index: {}]   ;;  %s2763_s12 = inlined_call_operand.vmem [shape: bf16[256,128], index: 12, kind: input, shape index: {}]   ;;  %s2764_s13 = inlined_call_operand.vmem [shape: f32[1,128], index: 13, kind: input, shape index: {}]   ;;  %s2765_s14 = inlined_call_operand.vmem [shape: f32[1,128], index: 14, kind: input, shape index: {}]   ;;  %s2766_s15 = inlined_call_operand.vmem [shape: f32[1,128], index: 15, kind: input, shape index: {}]   ;;  %s2767_s16 = inlined_call_operand.vmem [shape: bf16[2,8,128], index: 16, kind: output, shape index: {}]  }
   0x1   :  { %2769 = sst [smem:[#allocation7_spill]] %s2751_s0  ;;  %s2390_s23 = smov 0  }
   0x2 LB: > { %2770 = sst [smem:[#allocation5_spill]] %s2289_s22  ;;  %s38_s24 = sadd.s32 1, %s2289_s22  ;;  %s2293_s23 = sphi %s2390_s23, %s26_s23   ;;  %s2289_s22 = sphi %s2388_s22, %s2774_s22   ;;  %s2285_s21 = sphi %s2386_s21, %s2773_s21  }
   0x3   : > { %p1895_p0 = scmp.ge.s32.totalorder %s2293_s23, 1  ;;  %p40_p1 = scmp.ge.s32.totalorder %s38_s24, 2 }
   0x4   : > { %p475_p2 = scmp.lt.s32.totalorder %s2293_s23, 3 }
   0x5   : > { %s2776_s24 = smov (%p40_p1, %s38_s24), 0 }
   0x6   : > { %2771 = sst [smem:[#allocation6_spill]] %s2776_s24  ;;  %p476_p3 = pnand %p1895_p0, %p475_p2 }
   0x7   : > { %v2165_v0 = vld [vmem:[%s2755_s4 + $0x4] ss:$8 sps:$4 sm:$0xff] (!%p476_p3)   ;;  %v2167_v1 = vld [vmem:[%s2755_s4] ss:$8 sps:$4 sm:$0xff] (!%p476_p3)   ;;  %v2295_v2 = vmov (!%p476_p3), 0.0   ;;  %v2296_v3 = vmov (!%p476_p3), 0   ;;  %v564_v30 = vlaneseq (!%p476_p3) }
   0x8   : > { %479 = sbr.rel (%p476_p3) target bundleno = 2666 (0xa6a), region = 84  ;;  %2047 = vmatprep.subr.bf16.mxu1 (!%p476_p3), %v2295_v2  ;;  %686 = vmatprep.mubr.bf16.mxu0 (!%p476_p3), %v2296_v3  ;;  %v2168_v4 = vld [vmem:[%s2755_s4 + $0x14] ss:$8 sps:$4 sm:$0xff] (!%p476_p3)   ;;  %v2170_v5 = vld [vmem:[%s2755_s4 + $0x10] ss:$8 sps:$4 sm:$0xff] (!%p476_p3)   ;;  %vm2297_vm0 = vmmov (!%p476_p3), 0  }
   0x9   : > { %654 = vmatprep.subr.bf16.mxu0 (!%p476_p3), %v2165_v0  ;;  %2063 = vmatprep.mubr.msk.bf16.mxu1 (!%p476_p3), %vm2297_vm0, %v2295_v2  ;;  %v2171_v6 = vld [vmem:[%s2753_s2] sm:$0xff] (!%p476_p3)   ;;  %v2175_v8 = vld [vmem:[%s2753_s2 + $0x8] sm:$0xff] (!%p476_p3)   ;;  %p526_p4 = scmp.lt.s32.totalorder (!%p476_p3), %s2285_s21, 1  ;;  %v2176_v10 = vld [vmem:[%s2755_s4 + $0x34] ss:$8 sps:$4 sm:$0xff] (!%p476_p3)   ;;  %s2772_s29 = sld [smem:[#allocation7_spill]] (!%p476_p3) }
   0xa   : > { %655 = vmatpush1.bf16.msra.mxu0 (!%p476_p3), %v2167_v1  ;;  %v2172_v7 = vld [vmem:[%s2755_s4 + $0x24] ss:$8 sps:$4 sm:$0xff] (!%p476_p3)   ;;  %2048 = vmatpush3.bf16.msra.mxu1 (!%p476_p3), %v2171_v6  ;;  %v2174_v9 = vld [vmem:[%s2755_s4 + $0x20] ss:$8 sps:$4 sm:$0xff] (!%p476_p3)   ;;  %v2179_v11 = vld [vmem:[%s2753_s2 + $0x10] sm:$0xff] (!%p476_p3)   ;;  %v2510_v31 = vshrl.u32 (!%p476_p3), %v564_v30, 7 }
   0xb   : > { %656 = vmatprep.subr.bf16.mxu0 (!%p476_p3), %v2168_v4  ;;  %2049 = vmatprep.subr.bf16.mxu1 (!%p476_p3), %v2295_v2  ;;  %v2178_v12 = vld [vmem:[%s2755_s4 + $0x30] ss:$8 sps:$4 sm:$0xff] (!%p476_p3)   ;;  %v2180_v13 = vld [vmem:[%s2755_s4 + $0x44] ss:$8 sps:$4 sm:$0xff] (!%p476_p3)   ;;  %v2182_v15 = vld [vmem:[%s2755_s4 + $0x40] ss:$8 sps:$4 sm:$0xff] (!%p476_p3)  }
   0xc   : > { %v2183_v14 = vld [vmem:[%s2753_s2 + $0x18] sm:$0xff] (!%p476_p3)   ;;  %v2187_v17 = vld [vmem:[%s2753_s2 + $0x20] sm:$0xff] (!%p476_p3)   ;;  %v2191_v20 = vld [vmem:[%s2753_s2 + $0x28] sm:$0xff] (!%p476_p3)   ;;  %v566_v32 = vsub.s32 (!%p476_p3), 0, %v2510_v31  ;;  %v570_v34 = vsub.s32 (!%p476_p3), 1, %v2510_v31  ;;  %s2298_s26 = smov (!%p476_p3), 96  }
   0xd   : > { %v2184_v16 = vld [vmem:[%s2755_s4 + $0x54] ss:$8 sps:$4 sm:$0xff] (!%p476_p3)   ;;  %v2186_v18 = vld [vmem:[%s2755_s4 + $0x50] ss:$8 sps:$4 sm:$0xff] (!%p476_p3)   ;;  %v2188_v19 = vld [vmem:[%s2755_s4 + $0x64] ss:$8 sps:$4 sm:$0xff] (!%p476_p3)  }
   0xe   : > { %657 = vmatpush1.bf16.msra.mxu0 (!%p476_p3), %v2170_v5  ;;  %2050 = vmatpush3.bf16.msra.mxu1 (!%p476_p3), %v2175_v8  ;;  %v2190_v21 = vld [vmem:[%s2755_s4 + $0x60] ss:$8 sps:$4 sm:$0xff] (!%p476_p3)   ;;  %v2192_v24 = vld [vmem:[%s2755_s4 + $0x74] ss:$8 sps:$4 sm:$0xff] (!%p476_p3)   ;;  %v2194_v26 = vld [vmem:[%s2755_s4 + $0x70] ss:$8 sps:$4 sm:$0xff] (!%p476_p3)  }
   0xf   : > { %658 = vmatprep.subr.bf16.mxu0 %v2172_v7  ;;  %2051 = vmatprep.subr.bf16.mxu1 %v2295_v2  ;;  %s2778_s21 = smov (!%p526_p4, %s2285_s21), 1  ;;  %v543_v23 = vld [vmem:[%s2752_s1] sm:$0xff]  ;;  %v2195_v25 = vld [vmem:[%s2753_s2 + $0x30] sm:$0xff]   ;;  %v2196_v28 = vld [vmem:[%s2753_s2 + $0x38] sm:$0xff]   ;;  %vm819_vm1 = vcmask 261120   ;;  %vm882_vm2 = vcmask 1043456  }
  0x10   : > { %s1896_s0 = sshll.u32 %s2778_s21, 3  ;;  %v562_v33 = vld [vmem:[%s2756_s5] sm:$0x3]  ;;  %s2300_s22 = smov 32   ;;  %vm867_vm3 = vcmask 64512   ;;  %vm929_vm4 = vcmask 257024  }
  0x11   : > { %s529_s30 = scalar_lea.vmem %s2772_s29, %s1896_s0  ;;  %v567_v35 = vrot.slane %v562_v33, %v566_v32  ;;  %v571_v36 = vrot.slane %v562_v33, %v570_v34  ;;  %v1914_v38 = vld [vmem:[%s2754_s3] ss:$0 sm:$0xff]  ;;  %s2299_s0 = smov 64   ;;  %vm1058_vm5 = vcmask 519424   ;;  %vm1186_vm6 = vcmask 781824  }
  0x12   : > { %659 = vmatpush1.bf16.msra.mxu0 %v2174_v9  ;;  %2052 = vmatpush3.bf16.msra.mxu1 %v2179_v11  ;;  %v542_v22 = vld [vmem:[%s529_s30] sm:$0xff]  ;;  %vm1314_vm7 = vcmask 1044224  }
  0x13   : > { %660 = vmatprep.subr.bf16.mxu0 %v2176_v10  ;;  %2053 = vmatprep.subr.bf16.mxu1 %v2295_v2  ;;  %v2496_v27 = vadd.f32 %v543_v23, %v542_v22 }
  0x15   : > { %v545_v29 = vpack.c.bf16 %v2496_v27, %v2496_v27 }
  0x16   : > { %661 = vmatpush1.bf16.msra.mxu0 %v2178_v12  ;;  %2054 = vmatpush3.bf16.msra.mxu1 %v2183_v14 }
  0x17   : > { %662 = vmatprep.subr.bf16.mxu0 %v2180_v13  ;;  %2055 = vmatprep.subr.bf16.mxu1 %v2295_v2 }
  0x1a   : > { %663 = vmatpush1.bf16.msra.mxu0 %v2182_v15  ;;  %2056 = vmatpush3.bf16.msra.mxu1 %v2187_v17 }
  0x1b   : > { %664 = vmatprep.subr.bf16.mxu0 %v2184_v16  ;;  %2057 = vmatprep.subr.bf16.mxu1 %v2295_v2 }
  0x1e   : > { %665 = vmatpush1.bf16.msra.mxu0 %v2186_v18  ;;  %2058 = vmatpush3.bf16.msra.mxu1 %v2191_v20 }
  0x1f   : > { %666 = vmatprep.subr.bf16.mxu0 %v2188_v19  ;;  %2059 = vmatprep.subr.bf16.mxu1 %v2295_v2 }
  0x22   : > { %667 = vmatpush1.bf16.msra.mxu0 %v2190_v21  ;;  %2060 = vmatpush3.bf16.msra.mxu1 %v2195_v25 }
  0x23   : > { %668 = vmatprep.subr.bf16.mxu0 %v2192_v24  ;;  %2061 = vmatprep.subr.bf16.mxu1 %v2295_v2 }
  0x26   : > { %669 = vmatpush1.bf16.msra.mxu0 %v2194_v26  ;;  %2062 = vmatpush3.bf16.msra.mxu1 %v2196_v28 }
  0x27   : > { %2091 = vmatprep.subr.bf16.mxu0 %v2295_v2  ;;  %2067 = vmatprep.subr.bf16.mxu1 %v2295_v2 }
  0x29   : > { %687 = vmatmul.mubr.bf16.vlgmr.msra.gmra.mrb[0].mxu0 %v545_v29  ;;  %2064 = vmatmul.mubr.bf16.vlgmr.msra.gmra.mrb[0].mxu1 %v545_v29 }
  0x2a   : > { %2093 = vmatprep.mubr.msk.bf16.mxu0 %vm2297_vm0, %v2295_v2  ;;  %2069 = vmatprep.mubr.msk.bf16.mxu1 %vm2297_vm0, %v2295_v2 }
  0xfc   : > { %v688_v37 = vpop.f32.mrb[0].mxu0  ;;  %v811_v43 = vpop.f32.mrb[0].mxu1 }
  0xfd   : > { %v689_v39 = vadd.f32 %v688_v37, %v567_v35  ;;  %v690_v40 = vpop.f32.mrb[1].mxu0  ;;  %v812_v46 = vadd.f32 %v1914_v38, %v811_v43  ;;  %v2065_v47 = vpop.f32.mrb[1].mxu1 }
  0xfe   : > { %v691_v41 = vadd.f32 %v690_v40, %v571_v36  ;;  %v692_v42 = vpop.f32.mrb[2].mxu0  ;;  %v814_v49 = vpop.f32.mrb[2].mxu1 }
  0xff   : > { %v695_v44 = vpack.c.bf16 %v689_v39, %v689_v39  ;;  %v693_v45 = vpop.f32.mrb[3].mxu0  ;;  %v817_v50 = vpack.c.bf16 %v812_v46, %v812_v46  ;;  %v2066_v51 = vpop.f32.mrb[3].mxu1 }
 0x100   : > { %v697_v48 = vpack.c.bf16 %v691_v41, %v691_v41 }
 0x101   : > { %696 = vst [vmem:[#allocation2] sm:$0xf] %v695_v44  ;;  %933 = vrot.lane.b32.xlu1 %v817_v50, %s2298_s26 }
 0x102   : > { %698 = vst [vmem:[#allocation3] sm:$0xf] %v697_v48 }
 0x108   : > { %v818_v52 = vld [vmem:[#allocation2] sm:$0xf] }
 0x109   : > { %v2197_v53 = vld [vmem:[#allocation2] ss:$0 sps:$4 sm:$0xff]   ;;  %v824_v54 = vsel %vm819_vm1, %v818_v52, 0  ;;  %v878_v55 = vld [vmem:[#allocation3] sm:$0xf] }
 0x10a   : > { %2068 = vmatpush3.bf16.xpose.msra.mxu1 %v824_v54  ;;  %1066 = vrot.lane.b32.xlu1 %v2197_v53, %s2299_s0  ;;  %v2198_v56 = vld [vmem:[#allocation2] ss:$0 sps:$4 sm:$0xff]   ;;  %v884_v57 = vsel %vm882_vm2, %v878_v55, 0  ;;  %v2200_v22 = vld [vmem:[#allocation3] ss:$0 sps:$4 sm:$0xff]  }
 0x10b   : > { %2073 = vmatprep.subr.bf16.mxu1 %v2295_v2  ;;  %v2199_v9 = vld [vmem:[#allocation2] ss:$0 sps:$4 sm:$0xff]   ;;  %v2201_v47 = vld [vmem:[#allocation3] ss:$0 sps:$4 sm:$0xff]  }
 0x10c   : > { %v2202_v48 = vld [vmem:[#allocation3] ss:$0 sps:$4 sm:$0xff]  }
 0x10e   : > { %1061 = vrot.lane.b32.xlu1 %v817_v50, %s2299_s0 }
 0x111   : > { %2070 = vmatmul.mubr.msk.bf16.vlgmr.msra.gmra.mrb[4].mxu1 %vm819_vm1, %v817_v50 }
 0x112   : > { %2074 = vmatpush3.bf16.msra.mxu1 %v884_v57  ;;  %1194 = vrot.lane.b32.xlu1 %v2198_v56, %s2300_s22 }
 0x113   : > { %2075 = vmatprep.mubr.msk.bf16.mxu1 %vm2297_vm0, %v2295_v2  ;;  %2079 = vmatprep.subr.bf16.mxu1 %v2295_v2 }
 0x116   : > { %1189 = vrot.lane.b32.xlu1 %v817_v50, %s2300_s22 }
 0x173   : > { %v934_v58 = vpop.permute.xlu1 %933 }
 0x17c   : > { %v1067_v59 = vpop.permute.xlu1 %1066 }
 0x17d   : > { %v1072_v60 = vsel %vm819_vm1, %v1067_v59, 0 }
 0x17e   : > { %2092 = vmatpush3.bf16.xpose.msra.mxu0 %v1072_v60 }
 0x17f   : > { %2103 = vmatprep.subr.bf16.mxu0 %v2295_v2 }
 0x180   : > { %v1062_v61 = vpop.permute.xlu1 %1061 }
 0x184   : > { %v1195_v62 = vpop.permute.xlu1 %1194 }
 0x185   : > { %v1200_v63 = vsel %vm819_vm1, %v1195_v62, 0  ;;  %2094 = vmatmul.mubr.msk.bf16.vlgmr.msra.gmra.mrb[4].mxu0 %vm819_vm1, %v1062_v61 }
 0x186   : > { %2104 = vmatpush3.bf16.xpose.msra.mxu0 %v1200_v63  ;;  %2105 = vmatprep.mubr.msk.bf16.mxu0 %vm2297_vm0, %v2295_v2 }
 0x187   : > { %2115 = vmatprep.subr.bf16.mxu0 %v2295_v2 }
 0x188   : > { %v1190_v0 = vpop.permute.xlu1 %1189 }
 0x18d   : > { %2106 = vmatmul.mubr.msk.bf16.vlgmr.msra.gmra.mrb[8].mxu0 %vm819_vm1, %v1190_v0 }
 0x18e   : > { %2131 = vmatprep.mubr.msk.bf16.mxu0 %vm2297_vm0, %v2295_v2 }
 0x1e4   : > { %v860_v1 = vpop.f32.mrb[4].mxu1 }
 0x1e5   : > { %v866_v4 = vmul.f32 0.17677669, %v860_v1  ;;  %v2071_v5 = vpop.f32.mrb[5].mxu1 }
 0x1e6   : > { %v863_v6 = vpop.f32.mrb[6].mxu1 }
 0x1e7   : > { %v2072_v7 = vpop.f32.mrb[7].mxu1  ;;  %v868_v8 = vsel %vm867_vm3, %v866_v4, -inf }
 0x1e8   : > { %869 = vmax.xlane.f32.xlu0 %v868_v8 }
 0x1fe   : > { %938 = vrot.lane.b32.xlu0 %v2199_v9, %s2298_s26  ;;  %v2203_v9 = vld [vmem:[%s2757_s6] sm:$0xff]  }
 0x1ff   : > { %2116 = vmatpush3.bf16.msra.mxu0 %v2203_v9  ;;  %v2228_v9 = vld [vmem:[%s2761_s10 + $0x54] ss:$8 sps:$4 sm:$0xff]  }
 0x200   : > { %2117 = vmatprep.subr.bf16.mxu0 %v2295_v2 }
 0x258   : > { %v1108_v10 = vpop.f32.mrb[4].mxu0 }
 0x259   : > { %v1114_v11 = vmul.f32 0.17677669, %v1108_v10  ;;  %v2095_v12 = vpop.f32.mrb[5].mxu0  ;;  %v2204_v10 = vld [vmem:[%s2757_s6 + $0x8] sm:$0xff]  }
 0x25a   : > { %v1111_v13 = vpop.f32.mrb[6].mxu0  ;;  %2118 = vmatpush3.bf16.msra.mxu0 %v2204_v10  ;;  %v2226_v10 = vld [vmem:[%s2761_s10 + $0x50] ss:$8 sps:$4 sm:$0xff]  }
 0x25b   : > { %v2096_v14 = vpop.f32.mrb[7].mxu0  ;;  %v1115_v15 = vsel %vm867_vm3, %v1114_v11, -inf  ;;  %2119 = vmatprep.subr.bf16.mxu0 %v2295_v2 }
 0x25c   : > { %1116 = vmax.xlane.f32.xlu0 %v1115_v15 }
 0x260   : > { %v1236_v16 = vpop.f32.mrb[8].mxu0 }
 0x261   : > { %v1242_v17 = vmul.f32 0.17677669, %v1236_v16  ;;  %v2107_v18 = vpop.f32.mrb[9].mxu0  ;;  %v2205_v16 = vld [vmem:[%s2757_s6 + $0x10] sm:$0xff]  }
 0x262   : > { %v1239_v19 = vpop.f32.mrb[10].mxu0  ;;  %2120 = vmatpush3.bf16.msra.mxu0 %v2205_v16  ;;  %v2237_v16 = vld [vmem:[%s2763_s12 + $0x48] sm:$0xff]  }
 0x263   : > { %v2108_v20 = vpop.f32.mrb[11].mxu0  ;;  %v1243_v21 = vsel %vm867_vm3, %v1242_v17, -inf  ;;  %2121 = vmatprep.subr.bf16.mxu0 %v2295_v2 }
 0x264   : > { %1244 = vmax.xlane.f32.xlu1 %v1243_v21  ;;  %v2207_v21 = vld [vmem:[%s2757_s6 + $0x20] sm:$0xff]  }
 0x272   : > { %1001 = vrot.lane.b32.xlu0 %v2200_v22, %s2298_s26 }
 0x275   : > { %v870_v23 = vpop.xlane.xlu0 %869 }
 0x276   : > { %v871_v24 = vsub.f32 %v866_v4, %v870_v23 }
 0x278   : > { %v872_v25 = vmul.f32 1.442695, %v871_v24 }
 0x279   : > { %v939_v28 = vpop.permute.xlu0 %938 }
 0x27a   : > { %2251 = vpow2.f32 %v872_v25  ;;  %v944_v30 = vsel %vm819_vm1, %v939_v28, 0  ;;  %v2208_v25 = vld [vmem:[%s2757_s6 + $0x28] sm:$0xff]  }
 0x284   : > { %v2252_v26 = vpop.eup %2251 }
 0x285   : > { %v877_v29 = vpack.c.bf16 %v2252_v26, %v2252_v26  ;;  %v874_v5 = vsel %vm867_vm3, %v2252_v26, 0.0 }
 0x287   : > { %2076 = vmatmul.mubr.msk.bf16.vlgmr.msra.gmra.mrb[8].mxu1 %vm867_vm3, %v877_v29 }
 0x288   : > { %2080 = vmatpush3.bf16.xpose.msra.mxu1 %v944_v30  ;;  %2081 = vmatprep.mubr.msk.bf16.mxu1 %vm2297_vm0, %v2295_v2 }
 0x289   : > { %2085 = vmatprep.subr.bf16.mxu1 %v2295_v2 }
 0x28f   : > { %2082 = vmatmul.mubr.msk.bf16.vlgmr.msra.gmra.mrb[12].mxu1 %vm819_vm1, %v934_v58 }
 0x290   : > { %2087 = vmatprep.mubr.msk.bf16.mxu1 %vm2297_vm0, %v2295_v2 }
 0x2e9   : > { %v1117_v33 = vpop.xlane.xlu0 %1116 }
 0x2ea   : > { %v1118_v49 = vsub.f32 %v1114_v11, %v1117_v33  ;;  %v2209_v33 = vld [vmem:[%s2757_s6 + $0x30] sm:$0xff]  }
 0x2ec   : > { %v1119_v50 = vmul.f32 1.442695, %v1118_v49 }
 0x2ed   : > { %v1002_v35 = vpop.permute.xlu0 %1001 }
 0x2ee   : > { %v1007_v36 = vsel %vm882_vm2, %v1002_v35, 0  ;;  %2253 = vpow2.f32 %v1119_v50 }
 0x2ef   : > { %2086 = vmatpush3.bf16.msra.mxu1 %v1007_v36 }
 0x2f0   : > { %2097 = vmatprep.subr.bf16.mxu1 %v2295_v2 }
 0x2f1   : > { %v1245_v53 = vpop.xlane.xlu1 %1244 }
 0x2f2   : > { %v1246_v54 = vsub.f32 %v1242_v17, %v1245_v53  ;;  %v2206_v17 = vld [vmem:[%s2757_s6 + $0x18] sm:$0xff]  }
 0x2f3   : > { %2122 = vmatpush3.bf16.msra.mxu0 %v2206_v17  ;;  %v2238_v17 = vld [vmem:[%s2763_s12 + $0x8] sm:$0xff]  }
 0x2f4   : > { %v1247_v57 = vmul.f32 1.442695, %v1246_v54  ;;  %2123 = vmatprep.subr.bf16.mxu0 %v2295_v2 }
 0x2f7   : > { %2124 = vmatpush3.bf16.msra.mxu0 %v2207_v21  ;;  %v2242_v21 = vld [vmem:[%s2763_s12 + $0x18] sm:$0xff]  }
 0x2f8   : > { %v2254_v51 = vpop.eup %2253  ;;  %2125 = vmatprep.subr.bf16.mxu0 %v2295_v2 }
 0x2f9   : > { %v1121_v52 = vsel %vm867_vm3, %v2254_v51, 0.0  ;;  %v1124_v6 = vpack.c.bf16 %v2254_v51, %v2254_v51  ;;  %v1940_v51 = vld [vmem:[%s2758_s7] ss:$0 sm:$0xff] }
 0x2fb   : > { %2126 = vmatpush3.bf16.msra.mxu0 %v2208_v25  ;;  %v2246_v25 = vld [vmem:[%s2763_s12 + $0x28] sm:$0xff]  }
 0x2fc   : > { %2127 = vmatprep.subr.bf16.mxu0 %v2295_v2 }
 0x2ff   : > { %2128 = vmatpush3.bf16.msra.mxu0 %v2209_v33  ;;  %v1949_v33 = vld [vmem:[%s2759_s8] ss:$0 sm:$0xff] }
 0x300   : > { %2129 = vmatprep.subr.bf16.mxu0 %v2295_v2 }
 0x35a   : > { %v2561_v37 = vpop.f32.mrb[8].mxu1 }
 0x35b   : > { %v2077_v38 = vpop.f32.mrb[9].mxu1 }
 0x35c   : > { %v923_v39 = vpop.f32.mrb[10].mxu1  ;;  %v2210_v38 = vld [vmem:[%s2757_s6 + $0x38] sm:$0xff]  }
 0x35d   : > { %v2078_v40 = vpop.f32.mrb[11].mxu1  ;;  %2130 = vmatpush3.bf16.msra.mxu0 %v2210_v38 }
 0x362   : > { %v980_v41 = vpop.f32.mrb[12].mxu1 }
 0x363   : > { %v986_v42 = vmul.f32 0.17677669, %v980_v41  ;;  %v2083_v43 = vpop.f32.mrb[13].mxu1 }
 0x364   : > { %v983_v44 = vpop.f32.mrb[14].mxu1 }
 0x365   : > { %v2084_v45 = vpop.f32.mrb[15].mxu1  ;;  %v987_v46 = vsel %vm867_vm3, %v986_v42, -inf }
 0x366   : > { %988 = vmax.xlane.f32.xlu1 %v987_v46 }
 0x377   : > { %1129 = vrot.lane.b32.xlu1 %v2201_v47, %s2299_s0 }
 0x37b   : > { %1257 = vrot.lane.b32.xlu1 %v2202_v48, %s2300_s22 }
 0x39f   : > { %1122 = vadd.xlane.f32.xlu1 %v1121_v52 }
 0x3f3   : > { %v989_v55 = vpop.xlane.xlu1 %988 }
 0x3f4   : > { %v990_v56 = vsub.f32 %v986_v42, %v989_v55 }
 0x3f6   : > { %v991_v58 = vmul.f32 1.442695, %v990_v56 }
 0x3f7   : > { %v1130_v60 = vpop.permute.xlu1 %1129 }
 0x3f8   : > { %2255 = vpow2.f32 %v991_v58  ;;  %v1135_v0 = vsel %vm882_vm2, %v1130_v60, 0  ;;  %v2211_v58 = vld [vmem:[%s2761_s10] ss:$8 sps:$4 sm:$0xff]   ;;  %v2216_v60 = vld [vmem:[%s2761_s10 + $0x14] ss:$8 sps:$4 sm:$0xff]  }
 0x3f9   : > { %2257 = vpow2.f32 %v1247_v57 }
 0x3fb   : > { %v1258_v4 = vpop.permute.xlu1 %1257 }
 0x3fc   : > { %v1263_v7 = vsel %vm882_vm2, %v1258_v4, 0 }
 0x402   : > { %v2256_v59 = vpop.eup %2255 }
 0x403   : > { %v993_v61 = vsel %vm867_vm3, %v2256_v59, 0.0  ;;  %v996_v62 = vpack.c.bf16 %v2256_v59, %v2256_v59  ;;  %v2258_v63 = vpop.eup %2257  ;;  %v2213_v59 = vld [vmem:[%s2761_s10 + $0x4] ss:$8 sps:$4 sm:$0xff]  }
 0x404   : > { %994 = vadd.xlane.f32.xlu0 %v993_v61  ;;  %v1249_v1 = vsel %vm867_vm3, %v2258_v63, 0.0  ;;  %v1252_v8 = vpack.c.bf16 %v2258_v63, %v2258_v63  ;;  %v2214_v61 = vld [vmem:[%s2761_s10 + $0x10] ss:$8 sps:$4 sm:$0xff]  }
 0x405   : > { %2088 = vmatmul.mubr.msk.bf16.vlgmr.msra.gmra.mrb[16].mxu1 %vm867_vm3, %v996_v62  ;;  %v2217_v62 = vld [vmem:[%s2761_s10 + $0x20] ss:$8 sps:$4 sm:$0xff]  }
 0x406   : > { %2098 = vmatpush3.bf16.msra.mxu1 %v1135_v0  ;;  %2099 = vmatprep.mubr.msk.bf16.mxu1 %vm2297_vm0, %v2295_v2 }
 0x407   : > { %2109 = vmatprep.subr.bf16.mxu1 %v2295_v2 }
 0x408   : > { %1250 = vadd.xlane.f32.xlu0 %v1249_v1 }
 0x40c   : > { %875 = vadd.xlane.f32.xlu0 %v874_v5  ;;  %v2222_v5 = vld [vmem:[%s2761_s10 + $0x34] ss:$8 sps:$4 sm:$0xff]  }
 0x40d   : > { %2100 = vmatmul.mubr.msk.bf16.vlgmr.msra.gmra.mrb[20].mxu1 %vm867_vm3, %v1124_v6  ;;  %v2220_v6 = vld [vmem:[%s2761_s10 + $0x30] ss:$8 sps:$4 sm:$0xff]  }
 0x40e   : > { %2110 = vmatpush3.bf16.msra.mxu1 %v1263_v7  ;;  %2111 = vmatprep.mubr.msk.bf16.mxu1 %vm2297_vm0, %v2295_v2  ;;  %v2225_v7 = vld [vmem:[%s2761_s10 + $0x44] ss:$8 sps:$4 sm:$0xff]  }
 0x40f   : > { %1566 = vmatprep.subr.bf16.mxu1 %v2213_v59 }
 0x415   : > { %2112 = vmatmul.mubr.msk.bf16.vlgmr.msra.gmra.mrb[24].mxu1 %vm867_vm3, %v1252_v8  ;;  %v2223_v8 = vld [vmem:[%s2761_s10 + $0x40] ss:$8 sps:$4 sm:$0xff]  }
 0x416   : > { %1598 = vmatprep.mubr.bf16.mxu1 %v2296_v3  ;;  %1567 = vmatpush1.bf16.msra.mxu1 %v2211_v58 }
 0x417   : > { %1568 = vmatprep.subr.bf16.mxu1 %v2216_v60 }
 0x41a   : > { %1569 = vmatpush1.bf16.msra.mxu1 %v2214_v61 }
 0x42c   : > { %v1123_v18 = vpop.xlane.xlu1 %1122 }
 0x491   : > { %v995_v11 = vpop.xlane.xlu0 %994 }
 0x495   : > { %v1251_v12 = vpop.xlane.xlu0 %1250 }
 0x499   : > { %v876_v13 = vpop.xlane.xlu0 %875 }
 0x49a   : > { %2259 = vrcp.f32 %v876_v13  ;;  %v2234_v13 = vld [vmem:[%s2761_s10 + $0x74] ss:$8 sps:$4 sm:$0xff]  }
 0x49b   : > { %2261 = vrcp.f32 %v995_v11  ;;  %v2231_v11 = vld [vmem:[%s2761_s10 + $0x64] ss:$8 sps:$4 sm:$0xff]  }
 0x49c   : > { %2263 = vrcp.f32 %v1123_v18  ;;  %v2239_v18 = vld [vmem:[%s2763_s12 + $0x50] sm:$0xff]  }
 0x49d   : > { %2265 = vrcp.f32 %v1251_v12  ;;  %v2229_v12 = vld [vmem:[%s2761_s10 + $0x60] ss:$8 sps:$4 sm:$0xff]  }
 0x4a4   : > { %v2260_v14 = vpop.eup %2259 }
 0x4a5   : > { %v927_v3 = vmul.f32 %v2260_v14, %v2561_v37  ;;  %v2262_v19 = vpop.eup %2261  ;;  %v2232_v14 = vld [vmem:[%s2761_s10 + $0x70] ss:$8 sps:$4 sm:$0xff]  }
 0x4a6   : > { %v2264_v29 = vpop.eup %2263 }
 0x4a7   : > { %v928_v15 = vpack.c.bf16 %v927_v3, %v927_v3  ;;  %v2266_v41 = vpop.eup %2265  ;;  %v2235_v3 = vld [vmem:[%s2763_s12 + $0x40] sm:$0xff]  }
 0x4a8   : > { %2025 = vmatprep.subr.bf16.mxu0 %v2235_v3 }
 0x4a9   : > { %930 = vst.msk [vmem:[#allocation4] sm:$0xf] %vm929_vm4, %v928_v15  ;;  %v2236_v15 = vld [vmem:[%s2763_s12] sm:$0xff]  }
 0x4d8   : > { %v1043_v20 = vpop.f32.mrb[16].mxu1 }
 0x4d9   : > { %v1050_v22 = vmul.f32 %v2262_v19, %v1043_v20  ;;  %v2089_v23 = vpop.f32.mrb[17].mxu1  ;;  %v2240_v19 = vld [vmem:[%s2763_s12 + $0x10] sm:$0xff]   ;;  %v2241_v20 = vld [vmem:[%s2763_s12 + $0x58] sm:$0xff]  }
 0x4da   : > { %v1046_v24 = vpop.f32.mrb[18].mxu1  ;;  %v2244_v23 = vld [vmem:[%s2763_s12 + $0x20] sm:$0xff]  }
 0x4db   : > { %v1988_v26 = vpack.c.bf16 %v1050_v22, %v1050_v22  ;;  %v2090_v28 = vpop.f32.mrb[19].mxu1  ;;  %v2243_v22 = vld [vmem:[%s2763_s12 + $0x60] sm:$0xff]   ;;  %v2245_v24 = vld [vmem:[%s2763_s12 + $0x68] sm:$0xff]  }
 0x4dd   : > { %1055 = vrot.lane.b32.xlu1 %v1988_v26, %s2300_s22 }
 0x4e0   : > { %v1171_v30 = vpop.f32.mrb[20].mxu1 }
 0x4e1   : > { %v1178_v35 = vmul.f32 %v2264_v29, %v1171_v30  ;;  %v2101_v36 = vpop.f32.mrb[21].mxu1 }
 0x4e2   : > { %v1174_v37 = vpop.f32.mrb[22].mxu1  ;;  %v1950_v36 = vld [vmem:[%s2760_s9] ss:$0 sm:$0xff] }
 0x4e3   : > { %v1989_v39 = vpack.c.bf16 %v1178_v35, %v1178_v35  ;;  %v2102_v40 = vpop.f32.mrb[23].mxu1 }
 0x4e4   : > { %v2247_v40 = vld [vmem:[%s2763_s12 + $0x70] sm:$0xff]  }
 0x4e5   : > { %1183 = vrot.lane.b32.xlu0 %v1989_v39, %s2299_s0  ;;  %s1897_s0 = sshll.u32 %s2778_s21, 2 }
 0x4e6   : > { %s536_s18 = scalar_lea.vmem %s2767_s16, %s1897_s0 }
 0x4e8   : > { %v1299_v42 = vpop.f32.mrb[24].mxu1 }
 0x4e9   : > { %v1306_v43 = vmul.f32 %v2266_v41, %v1299_v42  ;;  %v2113_v44 = vpop.f32.mrb[25].mxu1  ;;  %v2248_v41 = vld [vmem:[%s2763_s12 + $0x30] sm:$0xff]   ;;  %v2249_v42 = vld [vmem:[%s2763_s12 + $0x78] sm:$0xff]  }
 0x4ea   : > { %v1302_v45 = vpop.f32.mrb[26].mxu1  ;;  %v1474_v44 = vld [vmem:[%s2762_s11] sm:$0x3] }
 0x4eb   : > { %v1990_v46 = vpack.c.bf16 %v1306_v43, %v1306_v43  ;;  %v2114_v47 = vpop.f32.mrb[27].mxu1  ;;  %v2250_v43 = vld [vmem:[%s2763_s12 + $0x38] sm:$0xff]   ;;  %v1479_v45 = vrot.slane %v1474_v44, %v566_v32  ;;  %v1967_v32 = vld [vmem:[%s2764_s13] ss:$0 sm:$0xff] }
 0x4ed   : > { %1311 = vrot.lane.b32.xlu1 %v1990_v46, %s2298_s26  ;;  %v1483_v46 = vrot.slane %v1474_v44, %v570_v34 }
 0x54f   : > { %v1056_v48 = vpop.permute.xlu1 %1055 }
 0x550   : > { %1059 = vst.msk [vmem:[#allocation4] sm:$0xf] %vm1058_vm5, %v1056_v48 }
 0x557   : > { %v1184_v49 = vpop.permute.xlu0 %1183 }
 0x558   : > { %1187 = vst.msk [vmem:[#allocation4] sm:$0xf] %vm1186_vm6, %v1184_v49 }
 0x55f   : > { %v1312_v2 = vpop.permute.xlu1 %1311 }
 0x560   : > { %1315 = vst.msk [vmem:[#allocation4] sm:$0xf] %vm1314_vm7, %v1312_v2 }
 0x567   : > { %v1316_v50 = vld [vmem:[#allocation4] sm:$0xf] }
 0x568   : > { %2132 = vmatmul.mubr.bf16.vlgmr.msra.gmra.mrb[12].mxu0 %v1316_v50 }
 0x569   : > { %2026 = vmatpush3.bf16.msra.mxu0 %v2236_v15 }
 0x56a   : > { %2027 = vmatprep.subr.bf16.mxu0 %v2237_v16 }
 0x56d   : > { %2028 = vmatpush3.bf16.msra.mxu0 %v2238_v17 }
 0x56e   : > { %2029 = vmatprep.subr.bf16.mxu0 %v2239_v18 }
 0x571   : > { %2030 = vmatpush3.bf16.msra.mxu0 %v2240_v19 }
 0x572   : > { %2031 = vmatprep.subr.bf16.mxu0 %v2241_v20 }
 0x575   : > { %2032 = vmatpush3.bf16.msra.mxu0 %v2242_v21 }
 0x576   : > { %2033 = vmatprep.subr.bf16.mxu0 %v2243_v22 }
 0x579   : > { %2034 = vmatpush3.bf16.msra.mxu0 %v2244_v23 }
 0x57a   : > { %2035 = vmatprep.subr.bf16.mxu0 %v2245_v24 }
 0x57d   : > { %2036 = vmatpush3.bf16.msra.mxu0 %v2246_v25 }
 0x57e   : > { %2037 = vmatprep.subr.bf16.mxu0 %v2247_v40 }
 0x581   : > { %2038 = vmatpush3.bf16.msra.mxu0 %v2248_v41 }
 0x582   : > { %2039 = vmatprep.subr.bf16.mxu0 %v2249_v42 }
 0x585   : > { %2040 = vmatpush3.bf16.msra.mxu0 %v2250_v43 }
 0x63b   : > { %v1422_v52 = vpop.f32.mrb[12].mxu0 }
 0x63c   : > { %v1423_v53 = vadd.f32 %v1940_v51, %v1422_v52  ;;  %v2133_v54 = vpop.f32.mrb[13].mxu0 }
 0x63d   : > { %v1425_v55 = vpop.f32.mrb[14].mxu0 }
 0x63e   : > { %v2134_v56 = vpop.f32.mrb[15].mxu0  ;;  %v1428_v57 = vadd.f32 %v1423_v53, %v2496_v27  ;;  %v2219_v27 = vld [vmem:[%s2761_s10 + $0x24] ss:$8 sps:$4 sm:$0xff]  }
 0x63f   : > { %1570 = vmatprep.subr.bf16.mxu1 %v2219_v27 }
 0x640   : > { %1429 = vadd.xlane.f32.xlu1 %v1428_v57  ;;  %1571 = vmatpush1.bf16.msra.mxu1 %v2217_v62 }
 0x641   : > { %1572 = vmatprep.subr.bf16.mxu1 %v2222_v5 }
 0x644   : > { %1573 = vmatpush1.bf16.msra.mxu1 %v2220_v6  ;;  %v1984_v6 = vld [vmem:[%s2765_s14] ss:$0 sm:$0xff] }
 0x645   : > { %1574 = vmatprep.subr.bf16.mxu1 %v2225_v7 }
 0x648   : > { %1575 = vmatpush1.bf16.msra.mxu1 %v2223_v8  ;;  %v1985_v8 = vld [vmem:[%s2766_s15] ss:$0 sm:$0xff] }
 0x649   : > { %1576 = vmatprep.subr.bf16.mxu1 %v2228_v9 }
 0x64c   : > { %1577 = vmatpush1.bf16.msra.mxu1 %v2226_v10 }
 0x64d   : > { %1578 = vmatprep.subr.bf16.mxu1 %v2231_v11 }
 0x650   : > { %1579 = vmatpush1.bf16.msra.mxu1 %v2229_v12 }
 0x651   : > { %1580 = vmatprep.subr.bf16.mxu1 %v2234_v13 }
 0x654   : > { %1581 = vmatpush1.bf16.msra.mxu1 %v2232_v14 }
 0x6cd   : > { %v1430_v63 = vpop.xlane.xlu1 %1429 }
 0x6ce   : > { %v1432_v0 = vmul.f32 0.0078125, %v1430_v63 }
 0x6d0   : > { %v1433_v1 = vsub.f32 %v1428_v57, %v1432_v0 }
 0x6d2   : > { %v1434_v4 = vmul.f32 %v1433_v1, %v1433_v1 }
 0x6d4   : > { %1435 = vadd.xlane.f32.xlu0 %v1434_v4 }
 0x761   : > { %v1436_v26 = vpop.xlane.xlu0 %1435 }
 0x762   : > { %v1437_v28 = vmul.f32 0.0078125, %v1436_v26 }
 0x764   : > { %v1438_v29 = vadd.f32 1e-05, %v1437_v28 }
 0x766   : > { %2267 = vrsqrt.f32 %v1438_v29 }
 0x770   : > { %v2268_v30 = vpop.eup %2267 }
 0x771   : > { %v1440_v35 = vmul.f32 %v2268_v30, %v1433_v1 }
 0x773   : > { %v1448_v37 = vmul.f32 %v1949_v33, %v1440_v35 }
 0x775   : > { %v1456_v38 = vadd.f32 %v1950_v36, %v1448_v37 }
 0x777   : > { %v1457_v39 = vpack.c.bf16 %v1456_v38, %v1456_v38 }
 0x779   : > { %1599 = vmatmul.mubr.bf16.vlgmr.msra.gmra.mrb[28].mxu1 %v1457_v39 }
 0x84c   : > { %v1600_v47 = vpop.f32.mrb[28].mxu1 }
 0x84d   : > { %v1601_v48 = vadd.f32 %v1600_v47, %v1479_v45  ;;  %v1602_v49 = vpop.f32.mrb[29].mxu1 }
 0x84e   : > { %v1603_v2 = vadd.f32 %v1602_v49, %v1483_v46  ;;  %v1604_v50 = vpop.f32.mrb[30].mxu1 }
 0x84f   : > { %v1607_v51 = vmax.f32 %v1601_v48, 0.0  ;;  %v1605_v52 = vpop.f32.mrb[31].mxu1 }
 0x850   : > { %v1608_v53 = vmax.f32 %v1603_v2, 0.0 }
 0x851   : > { %v1609_v55 = vpack.c.bf16 %v1607_v51, %v1607_v51 }
 0x852   : > { %v1610_v54 = vpack.c.bf16 %v1608_v53, %v1608_v53 }
 0x854   : > { %1778 = vmatprep.mubr.bf16.mxu0 %v1610_v54 }
 0x855   : > { %1779 = vmatmul.mubr.bf16.vlgmr.msra.gmra.mrb[16].mxu0 %v1609_v55 }
 0x928   : > { %v2041_v56 = vpop.f32.mrb[16].mxu0 }
 0x929   : > { %v2042_v57 = vpop.f32.mrb[17].mxu0 }
 0x92a   : > { %v2043_v31 = vadd.f32 %v2042_v57, %v2041_v56  ;;  %v2044_v34 = vpop.f32.mrb[18].mxu0 }
 0x92b   : > { %v2045_v58 = vpop.f32.mrb[19].mxu0 }
 0x92c   : > { %v1781_v59 = vadd.f32 %v2043_v31, %v1967_v32 }
 0x92e   : > { %v1786_v60 = vadd.f32 %v1781_v59, %v1456_v38 }
 0x930   : > { %1787 = vadd.xlane.f32.xlu0 %v1786_v60 }
 0x9bd   : > { %v1788_v61 = vpop.xlane.xlu0 %1787 }
 0x9be   : > { %v1789_v27 = vmul.f32 0.0078125, %v1788_v61 }
 0x9c0   : > { %v1790_v62 = vsub.f32 %v1786_v60, %v1789_v27 }
 0x9c2   : > { %v1791_v63 = vmul.f32 %v1790_v62, %v1790_v62 }
 0x9c4   : > { %1792 = vadd.xlane.f32.xlu1 %v1791_v63 }
 0xa51   : > { %v1793_v0 = vpop.xlane.xlu1 %1792 }
 0xa52   : > { %v1794_v1 = vmul.f32 0.0078125, %v1793_v0 }
 0xa54   : > { %v1795_v4 = vadd.f32 1e-05, %v1794_v1 }
 0xa56   : > { %2269 = vrsqrt.f32 %v1795_v4 }
 0xa60   : > { %v2270_v5 = vpop.eup %2269 }
 0xa61   : > { %v1797_v7 = vmul.f32 %v2270_v5, %v1790_v62 }
 0xa63   : > { %v1805_v9 = vmul.f32 %v1984_v6, %v1797_v7 }
 0xa65   : > { %v1813_v10 = vadd.f32 %v1985_v8, %v1805_v9 }
 0xa67   : > { %v1814_v11 = vpack.c.bf16 %v1813_v10, %v1813_v10 }
 0xa69   : > { %1815 = vst [vmem:[%s536_s18] sm:$0xf] %v1814_v11 }
 0xa6a PF: > { %s26_s23 = sadd.s32 1, %s2293_s23   ;;  %s2773_s21 = sld [smem:[#allocation5_spill]] }
 0xa6b   : > { %p23_p5 = scmp.ge.s32.totalorder %s26_s23, 4   ;;  %s2774_s22 = sld [smem:[#allocation6_spill]] }
 0xa6d   :  { %25 = sbr.rel (!%p23_p5) target bundleno = 2 (0x2), region = 120 }

</bundles_post_ra>
